<compile_context>
chip_gen: v6e
topology: v6e:2x2x1
jax: 0.10.0
libtpu: 0.0.40
codegen_flags: <defaults>
</compile_context>

<pallas_src>
import math

import jax
import jax.numpy as jnp
from jax.experimental import pallas as pl
from jax.experimental.pallas import tpu as pltpu

# ----- model hyper-parameters (small, consistent with the module's forward) ----
B, S, H = 2, 8, 32          # batch, sequence length, hidden size
NH, DH = 2, 16              # heads, head dim (NH * DH == H)
FF = 64                     # FFN intermediate size
NUM_LAYERS = 2
NUM_LABELS = 3
VOCAB = 100
LN_EPS = 1e-5
LANE = 128                  # lane-dense padding of slabs / classifier output

assert NH * DH == H
assert S & (S - 1) == 0, "S must be a power of two (in-kernel shift for batch id)"
LOG2_S = int(math.log2(S))

# ----- bf16 weight-slab layout (rows, all lane-padded to 128) -------------------
W_QKV_OFF = 0               # (H, 3H) fused Q|K|V
W_O_OFF = H                 # (H, H)
W_1_OFF = 2 * H             # (H, FF)
W_2_OFF = 3 * H             # (FF, H)
W_ROWS_PER_LAYER = 3 * H + FF

# ----- f32 slab layout -----------------------------------------------------------
VEC_ROW0 = 8                            # rows 0/1: embed-LN gamma/beta, rest pad
VEC_ROWS_PER_LAYER = 8                  # bqkv, bo, g1, be1, b1, b2, g2, be2
CLS_B_ROW = VEC_ROW0 + NUM_LAYERS * VEC_ROWS_PER_LAYER          # 24
CLS_W_ROW = 32                                                   # (H, LANE)
POS_ROW = CLS_W_ROW + H                                          # 64, (S, H)
TOK_ROW = POS_ROW + S                                            # 72, (VOCAB, H)
FSLAB_ROWS = ((TOK_ROW + VOCAB + 7) // 8) * 8                    # 176


# ----------------------------- shared math helpers -----------------------------
def _layernorm(x, gamma, beta):
    mu = jnp.mean(x, axis=-1, keepdims=True)
    var = jnp.mean((x - mu) ** 2, axis=-1, keepdims=True)
    return (x - mu) * jax.lax.rsqrt(var + LN_EPS) * gamma + beta


def _gelu(x):
    # tanh-approximate GELU (f32 elementwise path; tanh -> EUP)
    return 0.5 * x * (1.0 + jnp.tanh(0.7978845608028654 * (x + 0.044715 * x * x * x)))


def _encoder_layer(x2, bias, wslab, fslab, l, recip):
    """One transformer encoder layer (shared by kernel [refs] and reference [arrays]).

    x2   : (B*S, H) f32 hidden states (batch folded into matmul rows)
    bias : (B*S, B*S) f32 additive attention bias (block-diag + key padding)
    wslab: bf16 weight slab; fslab: f32 vector slab; l: layer index (static)
    """
    wb = l * W_ROWS_PER_LAYER
    vb = VEC_ROW0 + l * VEC_ROWS_PER_LAYER
    wqkv = wslab[wb + W_QKV_OFF:wb + W_QKV_OFF + H, :3 * H]     # (H, 3H) bf16
    wo = wslab[wb + W_O_OFF:wb + W_O_OFF + H, :H]               # (H, H)  bf16
    w1 = wslab[wb + W_1_OFF:wb + W_1_OFF + H, :FF]              # (H, FF) bf16
    w2 = wslab[wb + W_2_OFF:wb + W_2_OFF + FF, :H]              # (FF, H) bf16
    bqkv = fslab[vb + 0:vb + 1, :3 * H]                          # (1, 3H) f32
    bo = fslab[vb + 1:vb + 2, :H]
    g1 = fslab[vb + 2:vb + 3, :H]
    be1 = fslab[vb + 3:vb + 4, :H]
    b1 = fslab[vb + 4:vb + 5, :FF]
    b2 = fslab[vb + 5:vb + 6, :H]
    g2 = fslab[vb + 6:vb + 7, :H]
    be2 = fslab[vb + 7:vb + 8, :H]

    scale = 1.0 / math.sqrt(DH)

    # ---- attention: fused QKV (1 matmul), per-head static lane slices ----------
    x2b = x2.astype(jnp.bfloat16)                                # hoisted cast
    qkv = jnp.dot(x2b, wqkv, preferred_element_type=jnp.float32) + bqkv  # (B*S, 3H)

    ctx_heads = []
    for h in range(NH):                                          # static, NH == 2
        q = qkv[:, h * DH:(h + 1) * DH].astype(jnp.bfloat16)             # (B*S, DH)
        k = qkv[:, H + h * DH:H + (h + 1) * DH].astype(jnp.bfloat16)
        v = qkv[:, 2 * H + h * DH:2 * H + (h + 1) * DH].astype(jnp.bfloat16)
        # batch-folded scores with block-diagonal mask (no batched einsum)
        s = jnp.einsum('qd,kd->qk', q, k,
                       preferred_element_type=jnp.float32) * scale + bias  # (BS, BS)
        s_max = jnp.max(s, axis=-1, keepdims=True)
        e = jnp.exp(s - s_max)
        p = e * recip(jnp.sum(e, axis=-1, keepdims=True))
        ctx_heads.append(jnp.dot(p.astype(jnp.bfloat16), v,
                                 preferred_element_type=jnp.float32))      # (BS, DH)
    ctx_all = jnp.concatenate(ctx_heads, axis=-1)                # (B*S, H) head-major
    attn = jnp.dot(ctx_all.astype(jnp.bfloat16), wo,
                   preferred_element_type=jnp.float32) + bo

    # ---- residual + LN + FFN ----------------------------------------------------
    x1 = _layernorm(x2 + attn, g1, be1)
    x1b = x1.astype(jnp.bfloat16)                                # hoisted cast
    hmid = _gelu(jnp.dot(x1b, w1, preferred_element_type=jnp.float32) + b1)
    ffn = jnp.dot(hmid.astype(jnp.bfloat16), w2,
                  preferred_element_type=jnp.float32) + b2
    return _layernorm(x1 + ffn, g2, be2)


def _nli_forward_math(ids, keymask, wslab, fslab, recip):
    """Full forward on array-likes (jnp arrays or statically-sliced VMEM refs).

    ids     : (B*S, 1) int32 token ids
    keymask : (1, B*S) int32 attention mask (1 = valid key)
    Returns (B, LANE) f32 logits slab (labels in the first NUM_LABELS lanes).
    """
    # token embedding as an exact one-hot MXU matmul (in-kernel gather),
    # + position embeddings, + embedding LayerNorm
    onehot = (jax.lax.broadcasted_iota(jnp.int32, (B * S, VOCAB), 1)
              == ids).astype(jnp.float32)                        # (B*S, VOCAB)
    tok = fslab[TOK_ROW:TOK_ROW + VOCAB, :H]                     # (VOCAB, H) f32
    pos = fslab[POS_ROW:POS_ROW + S, :H]                         # (S, H)     f32
    x2 = jnp.dot(onehot, tok, preferred_element_type=jnp.float32)
    x2 = x2 + jnp.concatenate([pos] * B, axis=0)                 # (B*S, H)
    x2 = _layernorm(x2, fslab[0:1, :H], fslab[1:2, :H])

    # block-diagonal (per-example) additive attention bias merged with padding
    rb = jax.lax.broadcasted_iota(jnp.int32, (B * S, B * S), 0) >> LOG2_S
    cb = jax.lax.broadcasted_iota(jnp.int32, (B * S, B * S), 1) >> LOG2_S
    valid = (rb == cb) & (keymask > 0)                           # (B*S, B*S) bool
    bias = jnp.where(valid, 0.0, -1e9).astype(jnp.float32)

    for l in range(NUM_LAYERS):                                  # static unrolled
        x2 = _encoder_layer(x2, bias, wslab, fslab, l, recip)

    # CLS pooling (last_hidden_state[:, 0]) straight from the live value,
    # classifier kept in f32 for logit precision, lane-dense output slab
    cls = jnp.concatenate([x2[b * S:b * S + 1, :] for b in range(B)], axis=0)  # (B,H)
    cls_w = fslab[CLS_W_ROW:CLS_W_ROW + H, :]                    # (H, LANE) f32
    cls_b = fslab[CLS_B_ROW:CLS_B_ROW + 1, :]                    # (1, LANE) f32
    return jnp.dot(cls, cls_w, preferred_element_type=jnp.float32) + cls_b


# --------------------------------- fused kernel ---------------------------------
def nli_forward_kernel(ids_ref, mask_ref, wslab_ref, fslab_ref, out_ref):
    out_ref[...] = _nli_forward_math(
        ids_ref[...], mask_ref[...], wslab_ref, fslab_ref,
        lambda d: pl.reciprocal(d, approx=True))


def nli_forward_pallas(wslab, fslab, ids2, mask2):
    args = (ids2, mask2, wslab, fslab)
    return pl.pallas_call(
        nli_forward_kernel,
        out_shape=jax.ShapeDtypeStruct((B, LANE), jnp.float32),
        in_specs=[pl.BlockSpec(memory_space=pltpu.MemorySpace.VMEM)
                  for _ in args],
        out_specs=pl.BlockSpec(memory_space=pltpu.MemorySpace.VMEM),
    )(*args)


# ------------------------------- parameters & packing ---------------------------
def init_params(key):
    """Logical (PyTorch-layout) parameters of encoder + classifier."""
    keys = iter(jax.random.split(key, 64))

    def norm(shape, scale=0.02):
        return (scale * jax.random.normal(next(keys), shape)).astype(jnp.float32)

    layers = []
    for _ in range(NUM_LAYERS):
        layers.append(dict(
            wq=norm((H, H)), bq=norm((H,)),
            wk=norm((H, H)), bk=norm((H,)),
            wv=norm((H, H)), bv=norm((H,)),
            wo=norm((H, H)), bo=norm((H,)),
            g1=1.0 + norm((H,)), be1=norm((H,)),
            w1=norm((H, FF)), b1=norm((FF,)),
            w2=norm((FF, H)), b2=norm((H,)),
            g2=1.0 + norm((H,)), be2=norm((H,)),
        ))
    return dict(
        tok_emb=norm((VOCAB, H)), pos_emb=norm((S, H)),
        emb_g=1.0 + norm((H,)), emb_b=norm((H,)),
        layers=layers,
        # nn.Linear(hidden_size, num_labels): stored (in, out) == W^T
        cls_w=norm((H, NUM_LABELS)), cls_b=norm((NUM_LABELS,)),
    )


def pack_params(p):
    """Pack everything into two lane-padded slabs (two prologue DMAs).

    wslab (bf16): per layer [wqkv_fused(H,3H) | wo | w1 | w2], MXU input dtype.
    fslab (f32) : embed-LN, per-layer biases/LN params, cls_w, cls_b, pos_emb,
                  tok_emb (elementwise / f32-matmul path).
    """
    def pad2(a):
        a = jnp.asarray(a, jnp.float32)
        if a.ndim == 1:
            a = a.reshape(1, -1)
        return jnp.pad(a, ((0, 0), (0, LANE - a.shape[1])))

    # bf16 weight slab
    wrows = []
    for lp in p['layers']:
        wqkv = jnp.concatenate([lp['wq'], lp['wk'], lp['wv']], axis=1)   # (H, 3H)
        wrows += [pad2(wqkv), pad2(lp['wo']), pad2(lp['w1']), pad2(lp['w2'])]
    wslab = jnp.concatenate(wrows, axis=0)
    assert wslab.shape == (NUM_LAYERS * W_ROWS_PER_LAYER, LANE), wslab.shape

    # f32 vector/embedding slab
    zero_row = jnp.zeros((1, LANE), jnp.float32)
    frows = [pad2(p['emb_g']), pad2(p['emb_b'])] + [zero_row] * (VEC_ROW0 - 2)
    for lp in p['layers']:
        bqkv = jnp.concatenate([lp['bq'], lp['bk'], lp['bv']])           # (3H,)
        frows += [pad2(bqkv), pad2(lp['bo']), pad2(lp['g1']), pad2(lp['be1']),
                  pad2(lp['b1']), pad2(lp['b2']), pad2(lp['g2']), pad2(lp['be2'])]
    frows += [pad2(p['cls_b'])] + [zero_row] * (CLS_W_ROW - CLS_B_ROW - 1)
    frows += [pad2(p['cls_w']), pad2(p['pos_emb']), pad2(p['tok_emb'])]
    fslab = jnp.concatenate(frows, axis=0)
    fslab = jnp.pad(fslab, ((0, FSLAB_ROWS - fslab.shape[0]), (0, 0)))
    assert fslab.shape == (FSLAB_ROWS, LANE), fslab.shape

    return dict(wslab=wslab.astype(jnp.bfloat16), fslab=fslab)


# ------------------------------------ forward -----------------------------------
@jax.jit
def forward(packed, input_ids, attention_mask):
    """PlainNLIModel.forward(input_ids, attention_mask) -> logits (B, NUM_LABELS)."""
    ids2 = input_ids.reshape(B * S, 1).astype(jnp.int32)
    mask2 = attention_mask.reshape(1, B * S).astype(jnp.int32)
    logits_padded = nli_forward_pallas(packed['wslab'], packed['fslab'],
                                       ids2, mask2)              # single fused kernel
    return logits_padded[:, :NUM_LABELS]


@jax.jit
def ref_forward(packed, input_ids, attention_mask):
    """Pure-JAX reference with identical math (exact reciprocal; sanity check)."""
    ids2 = input_ids.reshape(B * S, 1).astype(jnp.int32)
    mask2 = attention_mask.reshape(1, B * S).astype(jnp.int32)
    logits = _nli_forward_math(ids2, mask2, packed['wslab'], packed['fslab'],
                               lambda d: 1.0 / d)
    return logits[:, :NUM_LABELS]


if __name__ == "__main__":
    root = jax.random.PRNGKey(0)
    pkey, ikey = jax.random.split(root)
    packed = pack_params(init_params(pkey))

    input_ids = jax.random.randint(ikey, (B, S), 0, VOCAB, dtype=jnp.int32)
    # lengths 8 and 5 -> second example has padding
    positions = jnp.arange(S)[None, :]
    lengths = jnp.array([[S], [5]], dtype=jnp.int32)
    attention_mask = (positions < lengths).astype(jnp.int32)

    logits = jax.block_until_ready(forward(packed, input_ids, attention_mask))
    ref = jax.block_until_ready(ref_forward(packed, input_ids, attention_mask))

    max_diff = float(jnp.max(jnp.abs(logits - ref)))
    assert logits.shape == (B, NUM_LABELS), logits.shape
    assert max_diff < 2e-2, f"mismatch vs pure-JAX reference: {max_diff}"

    print("KERNEL_OK")
</pallas_src>

<mosaic_0001>
module attributes {stable_mosaic.version = 11 : i64} {
  func.func @nli_forward_kernel(%arg0: memref<16x1xi32, #tpu.memory_space<vmem>>, %arg1: memref<1x16xi32, #tpu.memory_space<vmem>>, %arg2: memref<320x128xbf16, #tpu.memory_space<vmem>>, %arg3: memref<176x128xf32, #tpu.memory_space<vmem>>, %arg4: memref<2x128xf32, #tpu.memory_space<vmem>>) attributes {dimension_semantics = [], scalar_prefetch = 0 : i64, scratch_operands = 0 : i64, tpu.core_type = #tpu.core_type<tc>} {
    %c0 = arith.constant 0 : index
    %c0_0 = arith.constant 0 : index
    %0 = vector.load %arg0[%c0, %c0_0] : memref<16x1xi32, #tpu.memory_space<vmem>>, vector<16x1xi32>
    %c0_1 = arith.constant 0 : index
    %c0_2 = arith.constant 0 : index
    %1 = vector.load %arg1[%c0_1, %c0_2] : memref<1x16xi32, #tpu.memory_space<vmem>>, vector<1x16xi32>
    %2 = tpu.iota {dimensions = array<i32: 1>} : vector<16x100xi32>
    %3 = vector.broadcast %0 : vector<16x1xi32> to vector<16x100xi32>
    %4 = arith.cmpi eq, %2, %3 : vector<16x100xi32>
    %5 = arith.extui %4 : vector<16x100xi1> to vector<16x100xi32>
    %6 = arith.sitofp %5 : vector<16x100xi32> to vector<16x100xf32>
    %c72 = arith.constant 72 : index
    %c0_3 = arith.constant 0 : index
    %7 = vector.load %arg3[%c72, %c0_3] : memref<176x128xf32, #tpu.memory_space<vmem>>, vector<100x32xf32>
    %c64 = arith.constant 64 : index
    %c0_4 = arith.constant 0 : index
    %8 = vector.load %arg3[%c64, %c0_4] : memref<176x128xf32, #tpu.memory_space<vmem>>, vector<8x32xf32>
    %cst = arith.constant dense<0.000000e+00> : vector<16x32xf32>
    %9 = tpu.matmul %6, %7, %cst {dimension_numbers = #tpu.dot_dimension_numbers<[1], [0], [0], [1], [0, 0, 1, 1], [], []>} : vector<16x100xf32>, vector<100x32xf32>, vector<16x32xf32> -> vector<16x32xf32>
    %10 = tpu.concatenate %8, %8 in 0 : vector<8x32xf32>, vector<8x32xf32> -> vector<16x32xf32>
    %11 = arith.addf %9, %10 : vector<16x32xf32>
    %c0_5 = arith.constant 0 : index
    %c0_6 = arith.constant 0 : index
    %12 = vector.load %arg3[%c0_5, %c0_6] : memref<176x128xf32, #tpu.memory_space<vmem>>, vector<1x32xf32>
    %c1 = arith.constant 1 : index
    %c0_7 = arith.constant 0 : index
    %13 = vector.load %arg3[%c1, %c0_7] : memref<176x128xf32, #tpu.memory_space<vmem>>, vector<1x32xf32>
    %cst_8 = arith.constant dense<0.000000e+00> : vector<16xf32>
    %14 = vector.multi_reduction <add>, %11, %cst_8 [1] : vector<16x32xf32> to vector<16xf32>
    %15 = vector.shape_cast %14 : vector<16xf32> to vector<16x1xf32>
    %cst_9 = arith.constant 3.200000e+01 : f32
    %16 = vector.broadcast %cst_9 : f32 to vector<16x1xf32>
    %17 = arith.divf %15, %16 : vector<16x1xf32>
    %18 = vector.broadcast %17 : vector<16x1xf32> to vector<16x32xf32>
    %19 = arith.subf %11, %18 : vector<16x32xf32>
    %20 = arith.mulf %19, %19 : vector<16x32xf32>
    %cst_10 = arith.constant dense<0.000000e+00> : vector<16xf32>
    %21 = vector.multi_reduction <add>, %20, %cst_10 [1] : vector<16x32xf32> to vector<16xf32>
    %22 = vector.shape_cast %21 : vector<16xf32> to vector<16x1xf32>
    %cst_11 = arith.constant 3.200000e+01 : f32
    %23 = vector.broadcast %cst_11 : f32 to vector<16x1xf32>
    %24 = arith.divf %22, %23 : vector<16x1xf32>
    %25 = vector.broadcast %17 : vector<16x1xf32> to vector<16x32xf32>
    %26 = arith.subf %11, %25 : vector<16x32xf32>
    %cst_12 = arith.constant 9.99999974E-6 : f32
    %27 = vector.broadcast %cst_12 : f32 to vector<16x1xf32>
    %28 = arith.addf %24, %27 : vector<16x1xf32>
    %29 = math.rsqrt %28 : vector<16x1xf32>
    %30 = vector.broadcast %29 : vector<16x1xf32> to vector<16x32xf32>
    %31 = arith.mulf %26, %30 : vector<16x32xf32>
    %32 = vector.broadcast %12 : vector<1x32xf32> to vector<16x32xf32>
    %33 = arith.mulf %31, %32 : vector<16x32xf32>
    %34 = vector.broadcast %13 : vector<1x32xf32> to vector<16x32xf32>
    %35 = arith.addf %33, %34 : vector<16x32xf32>
    %36 = tpu.iota {dimensions = array<i32: 0>} : vector<16x16xi32>
    %c3_i32 = arith.constant 3 : i32
    %37 = vector.broadcast %c3_i32 : i32 to vector<16x16xi32>
    %38 = arith.shrsi %36, %37 : vector<16x16xi32>
    %39 = tpu.iota {dimensions = array<i32: 1>} : vector<16x16xi32>
    %c3_i32_13 = arith.constant 3 : i32
    %40 = vector.broadcast %c3_i32_13 : i32 to vector<16x16xi32>
    %41 = arith.shrsi %39, %40 : vector<16x16xi32>
    %42 = arith.cmpi eq, %38, %41 : vector<16x16xi32>
    %c0_i32 = arith.constant 0 : i32
    %43 = vector.broadcast %c0_i32 : i32 to vector<1x16xi32>
    %44 = arith.cmpi sgt, %1, %43 : vector<1x16xi32>
    %45 = vector.broadcast %44 : vector<1x16xi1> to vector<16x16xi1>
    %46 = arith.andi %42, %45 : vector<16x16xi1>
    %cst_14 = arith.constant 0.000000e+00 : f32
    %cst_15 = arith.constant -1.000000e+09 : f32
    %47 = vector.broadcast %cst_14 : f32 to vector<16x16xf32>
    %48 = vector.broadcast %cst_15 : f32 to vector<16x16xf32>
    %49 = arith.select %46, %47, %48 : vector<16x16xi1>, vector<16x16xf32>
    %c0_16 = arith.constant 0 : index
    %c0_17 = arith.constant 0 : index
    %50 = vector.load %arg2[%c0_16, %c0_17] : memref<320x128xbf16, #tpu.memory_space<vmem>>, vector<32x96xbf16>
    %c32 = arith.constant 32 : index
    %c0_18 = arith.constant 0 : index
    %51 = vector.load %arg2[%c32, %c0_18] : memref<320x128xbf16, #tpu.memory_space<vmem>>, vector<32x32xbf16>
    %c64_19 = arith.constant 64 : index
    %c0_20 = arith.constant 0 : index
    %52 = vector.load %arg2[%c64_19, %c0_20] : memref<320x128xbf16, #tpu.memory_space<vmem>>, vector<32x64xbf16>
    %c96 = arith.constant 96 : index
    %c0_21 = arith.constant 0 : index
    %53 = vector.load %arg2[%c96, %c0_21] : memref<320x128xbf16, #tpu.memory_space<vmem>>, vector<64x32xbf16>
    %c8 = arith.constant 8 : index
    %c0_22 = arith.constant 0 : index
    %54 = vector.load %arg3[%c8, %c0_22] : memref<176x128xf32, #tpu.memory_space<vmem>>, vector<1x96xf32>
    %c9 = arith.constant 9 : index
    %c0_23 = arith.constant 0 : index
    %55 = vector.load %arg3[%c9, %c0_23] : memref<176x128xf32, #tpu.memory_space<vmem>>, vector<1x32xf32>
    %c10 = arith.constant 10 : index
    %c0_24 = arith.constant 0 : index
    %56 = vector.load %arg3[%c10, %c0_24] : memref<176x128xf32, #tpu.memory_space<vmem>>, vector<1x32xf32>
    %c11 = arith.constant 11 : index
    %c0_25 = arith.constant 0 : index
    %57 = vector.load %arg3[%c11, %c0_25] : memref<176x128xf32, #tpu.memory_space<vmem>>, vector<1x32xf32>
    %c12 = arith.constant 12 : index
    %c0_26 = arith.constant 0 : index
    %58 = vector.load %arg3[%c12, %c0_26] : memref<176x128xf32, #tpu.memory_space<vmem>>, vector<1x64xf32>
    %c13 = arith.constant 13 : index
    %c0_27 = arith.constant 0 : index
    %59 = vector.load %arg3[%c13, %c0_27] : memref<176x128xf32, #tpu.memory_space<vmem>>, vector<1x32xf32>
    %c14 = arith.constant 14 : index
    %c0_28 = arith.constant 0 : index
    %60 = vector.load %arg3[%c14, %c0_28] : memref<176x128xf32, #tpu.memory_space<vmem>>, vector<1x32xf32>
    %c15 = arith.constant 15 : index
    %c0_29 = arith.constant 0 : index
    %61 = vector.load %arg3[%c15, %c0_29] : memref<176x128xf32, #tpu.memory_space<vmem>>, vector<1x32xf32>
    %62 = arith.truncf %35 : vector<16x32xf32> to vector<16x32xbf16>
    %cst_30 = arith.constant dense<0.000000e+00> : vector<16x96xf32>
    %63 = tpu.matmul %62, %50, %cst_30 {dimension_numbers = #tpu.dot_dimension_numbers<[1], [0], [0], [1], [0, 0, 1, 1], [], []>} : vector<16x32xbf16>, vector<32x96xbf16>, vector<16x96xf32> -> vector<16x96xf32>
    %64 = vector.broadcast %54 : vector<1x96xf32> to vector<16x96xf32>
    %65 = arith.addf %63, %64 : vector<16x96xf32>
    %66 = vector.extract_strided_slice %65 {offsets = [0, 0], sizes = [16, 16], strides = [1, 1]} : vector<16x96xf32> to vector<16x16xf32>
    %67 = arith.truncf %66 : vector<16x16xf32> to vector<16x16xbf16>
    %68 = vector.extract_strided_slice %65 {offsets = [0, 32], sizes = [16, 16], strides = [1, 1]} : vector<16x96xf32> to vector<16x16xf32>
    %69 = arith.truncf %68 : vector<16x16xf32> to vector<16x16xbf16>
    %70 = vector.extract_strided_slice %65 {offsets = [0, 64], sizes = [16, 16], strides = [1, 1]} : vector<16x96xf32> to vector<16x16xf32>
    %71 = arith.truncf %70 : vector<16x16xf32> to vector<16x16xbf16>
    "tpu.trace_start"() <{level = 10 : i32, message = "qd,kd->qk"}> : () -> ()
    %cst_31 = arith.constant dense<0.000000e+00> : vector<16x16xf32>
    %72 = tpu.matmul %67, %69, %cst_31 {dimension_numbers = #tpu.dot_dimension_numbers<[1], [1], [0], [0], [0, 0, 1, 0], [], []>} : vector<16x16xbf16>, vector<16x16xbf16>, vector<16x16xf32> -> vector<16x16xf32>
    "tpu.trace_stop"() : () -> ()
    %cst_32 = arith.constant 2.500000e-01 : f32
    %73 = vector.broadcast %cst_32 : f32 to vector<16x16xf32>
    %74 = arith.mulf %72, %73 : vector<16x16xf32>
    %75 = arith.addf %74, %49 : vector<16x16xf32>
    %cst_33 = arith.constant dense<0xFF800000> : vector<16xf32>
    %76 = vector.multi_reduction <maximumf>, %75, %cst_33 [1] : vector<16x16xf32> to vector<16xf32>
    %77 = vector.shape_cast %76 : vector<16xf32> to vector<16x1xf32>
    %78 = vector.broadcast %77 : vector<16x1xf32> to vector<16x16xf32>
    %79 = arith.subf %75, %78 : vector<16x16xf32>
    %80 = math.exp %79 : vector<16x16xf32>
    %cst_34 = arith.constant dense<0.000000e+00> : vector<16xf32>
    %81 = vector.multi_reduction <add>, %80, %cst_34 [1] : vector<16x16xf32> to vector<16xf32>
    %82 = vector.shape_cast %81 : vector<16xf32> to vector<16x1xf32>
    %83 = tpu.reciprocal %82 {approx = true} : vector<16x1xf32> -> vector<16x1xf32>
    %84 = vector.broadcast %83 : vector<16x1xf32> to vector<16x16xf32>
    %85 = arith.mulf %80, %84 : vector<16x16xf32>
    %86 = arith.truncf %85 : vector<16x16xf32> to vector<16x16xbf16>
    %cst_35 = arith.constant dense<0.000000e+00> : vector<16x16xf32>
    %87 = tpu.matmul %86, %71, %cst_35 {dimension_numbers = #tpu.dot_dimension_numbers<[1], [0], [0], [1], [0, 0, 1, 1], [], []>} : vector<16x16xbf16>, vector<16x16xbf16>, vector<16x16xf32> -> vector<16x16xf32>
    %88 = vector.extract_strided_slice %65 {offsets = [0, 16], sizes = [16, 16], strides = [1, 1]} : vector<16x96xf32> to vector<16x16xf32>
    %89 = arith.truncf %88 : vector<16x16xf32> to vector<16x16xbf16>
    %90 = vector.extract_strided_slice %65 {offsets = [0, 48], sizes = [16, 16], strides = [1, 1]} : vector<16x96xf32> to vector<16x16xf32>
    %91 = arith.truncf %90 : vector<16x16xf32> to vector<16x16xbf16>
    %92 = vector.extract_strided_slice %65 {offsets = [0, 80], sizes = [16, 16], strides = [1, 1]} : vector<16x96xf32> to vector<16x16xf32>
    %93 = arith.truncf %92 : vector<16x16xf32> to vector<16x16xbf16>
    "tpu.trace_start"() <{level = 10 : i32, message = "qd,kd->qk"}> : () -> ()
    %cst_36 = arith.constant dense<0.000000e+00> : vector<16x16xf32>
    %94 = tpu.matmul %89, %91, %cst_36 {dimension_numbers = #tpu.dot_dimension_numbers<[1], [1], [0], [0], [0, 0, 1, 0], [], []>} : vector<16x16xbf16>, vector<16x16xbf16>, vector<16x16xf32> -> vector<16x16xf32>
    "tpu.trace_stop"() : () -> ()
    %cst_37 = arith.constant 2.500000e-01 : f32
    %95 = vector.broadcast %cst_37 : f32 to vector<16x16xf32>
    %96 = arith.mulf %94, %95 : vector<16x16xf32>
    %97 = arith.addf %96, %49 : vector<16x16xf32>
    %cst_38 = arith.constant dense<0xFF800000> : vector<16xf32>
    %98 = vector.multi_reduction <maximumf>, %97, %cst_38 [1] : vector<16x16xf32> to vector<16xf32>
    %99 = vector.shape_cast %98 : vector<16xf32> to vector<16x1xf32>
    %100 = vector.broadcast %99 : vector<16x1xf32> to vector<16x16xf32>
    %101 = arith.subf %97, %100 : vector<16x16xf32>
    %102 = math.exp %101 : vector<16x16xf32>
    %cst_39 = arith.constant dense<0.000000e+00> : vector<16xf32>
    %103 = vector.multi_reduction <add>, %102, %cst_39 [1] : vector<16x16xf32> to vector<16xf32>
    %104 = vector.shape_cast %103 : vector<16xf32> to vector<16x1xf32>
    %105 = tpu.reciprocal %104 {approx = true} : vector<16x1xf32> -> vector<16x1xf32>
    %106 = vector.broadcast %105 : vector<16x1xf32> to vector<16x16xf32>
    %107 = arith.mulf %102, %106 : vector<16x16xf32>
    %108 = arith.truncf %107 : vector<16x16xf32> to vector<16x16xbf16>
    %cst_40 = arith.constant dense<0.000000e+00> : vector<16x16xf32>
    %109 = tpu.matmul %108, %93, %cst_40 {dimension_numbers = #tpu.dot_dimension_numbers<[1], [0], [0], [1], [0, 0, 1, 1], [], []>} : vector<16x16xbf16>, vector<16x16xbf16>, vector<16x16xf32> -> vector<16x16xf32>
    %110 = tpu.concatenate %87, %109 in 1 : vector<16x16xf32>, vector<16x16xf32> -> vector<16x32xf32>
    %111 = arith.truncf %110 : vector<16x32xf32> to vector<16x32xbf16>
    %cst_41 = arith.constant dense<0.000000e+00> : vector<16x32xf32>
    %112 = tpu.matmul %111, %51, %cst_41 {dimension_numbers = #tpu.dot_dimension_numbers<[1], [0], [0], [1], [0, 0, 1, 1], [], []>} : vector<16x32xbf16>, vector<32x32xbf16>, vector<16x32xf32> -> vector<16x32xf32>
    %113 = vector.broadcast %55 : vector<1x32xf32> to vector<16x32xf32>
    %114 = arith.addf %112, %113 : vector<16x32xf32>
    %115 = arith.addf %35, %114 : vector<16x32xf32>
    %cst_42 = arith.constant dense<0.000000e+00> : vector<16xf32>
    %116 = vector.multi_reduction <add>, %115, %cst_42 [1] : vector<16x32xf32> to vector<16xf32>
    %117 = vector.shape_cast %116 : vector<16xf32> to vector<16x1xf32>
    %cst_43 = arith.constant 3.200000e+01 : f32
    %118 = vector.broadcast %cst_43 : f32 to vector<16x1xf32>
    %119 = arith.divf %117, %118 : vector<16x1xf32>
    %120 = vector.broadcast %119 : vector<16x1xf32> to vector<16x32xf32>
    %121 = arith.subf %115, %120 : vector<16x32xf32>
    %122 = arith.mulf %121, %121 : vector<16x32xf32>
    %cst_44 = arith.constant dense<0.000000e+00> : vector<16xf32>
    %123 = vector.multi_reduction <add>, %122, %cst_44 [1] : vector<16x32xf32> to vector<16xf32>
    %124 = vector.shape_cast %123 : vector<16xf32> to vector<16x1xf32>
    %cst_45 = arith.constant 3.200000e+01 : f32
    %125 = vector.broadcast %cst_45 : f32 to vector<16x1xf32>
    %126 = arith.divf %124, %125 : vector<16x1xf32>
    %127 = vector.broadcast %119 : vector<16x1xf32> to vector<16x32xf32>
    %128 = arith.subf %115, %127 : vector<16x32xf32>
    %cst_46 = arith.constant 9.99999974E-6 : f32
    %129 = vector.broadcast %cst_46 : f32 to vector<16x1xf32>
    %130 = arith.addf %126, %129 : vector<16x1xf32>
    %131 = math.rsqrt %130 : vector<16x1xf32>
    %132 = vector.broadcast %131 : vector<16x1xf32> to vector<16x32xf32>
    %133 = arith.mulf %128, %132 : vector<16x32xf32>
    %134 = vector.broadcast %56 : vector<1x32xf32> to vector<16x32xf32>
    %135 = arith.mulf %133, %134 : vector<16x32xf32>
    %136 = vector.broadcast %57 : vector<1x32xf32> to vector<16x32xf32>
    %137 = arith.addf %135, %136 : vector<16x32xf32>
    %138 = arith.truncf %137 : vector<16x32xf32> to vector<16x32xbf16>
    %cst_47 = arith.constant dense<0.000000e+00> : vector<16x64xf32>
    %139 = tpu.matmul %138, %52, %cst_47 {dimension_numbers = #tpu.dot_dimension_numbers<[1], [0], [0], [1], [0, 0, 1, 1], [], []>} : vector<16x32xbf16>, vector<32x64xbf16>, vector<16x64xf32> -> vector<16x64xf32>
    %140 = vector.broadcast %58 : vector<1x64xf32> to vector<16x64xf32>
    %141 = arith.addf %139, %140 : vector<16x64xf32>
    %cst_48 = arith.constant 5.000000e-01 : f32
    %142 = vector.broadcast %cst_48 : f32 to vector<16x64xf32>
    %143 = arith.mulf %142, %141 : vector<16x64xf32>
    %cst_49 = arith.constant 4.471500e-02 : f32
    %144 = vector.broadcast %cst_49 : f32 to vector<16x64xf32>
    %145 = arith.mulf %144, %141 : vector<16x64xf32>
    %146 = arith.mulf %145, %141 : vector<16x64xf32>
    %147 = arith.mulf %146, %141 : vector<16x64xf32>
    %148 = arith.addf %141, %147 : vector<16x64xf32>
    %cst_50 = arith.constant 0.797884583 : f32
    %149 = vector.broadcast %cst_50 : f32 to vector<16x64xf32>
    %150 = arith.mulf %149, %148 : vector<16x64xf32>
    %151 = math.tanh %150 : vector<16x64xf32>
    %cst_51 = arith.constant 1.000000e+00 : f32
    %152 = vector.broadcast %cst_51 : f32 to vector<16x64xf32>
    %153 = arith.addf %152, %151 : vector<16x64xf32>
    %154 = arith.mulf %143, %153 : vector<16x64xf32>
    %155 = arith.truncf %154 : vector<16x64xf32> to vector<16x64xbf16>
    %cst_52 = arith.constant dense<0.000000e+00> : vector<16x32xf32>
    %156 = tpu.matmul %155, %53, %cst_52 {dimension_numbers = #tpu.dot_dimension_numbers<[1], [0], [0], [1], [0, 0, 1, 1], [], []>} : vector<16x64xbf16>, vector<64x32xbf16>, vector<16x32xf32> -> vector<16x32xf32>
    %157 = vector.broadcast %59 : vector<1x32xf32> to vector<16x32xf32>
    %158 = arith.addf %156, %157 : vector<16x32xf32>
    %159 = arith.addf %137, %158 : vector<16x32xf32>
    %cst_53 = arith.constant dense<0.000000e+00> : vector<16xf32>
    %160 = vector.multi_reduction <add>, %159, %cst_53 [1] : vector<16x32xf32> to vector<16xf32>
    %161 = vector.shape_cast %160 : vector<16xf32> to vector<16x1xf32>
    %cst_54 = arith.constant 3.200000e+01 : f32
    %162 = vector.broadcast %cst_54 : f32 to vector<16x1xf32>
    %163 = arith.divf %161, %162 : vector<16x1xf32>
    %164 = vector.broadcast %163 : vector<16x1xf32> to vector<16x32xf32>
    %165 = arith.subf %159, %164 : vector<16x32xf32>
    %166 = arith.mulf %165, %165 : vector<16x32xf32>
    %cst_55 = arith.constant dense<0.000000e+00> : vector<16xf32>
    %167 = vector.multi_reduction <add>, %166, %cst_55 [1] : vector<16x32xf32> to vector<16xf32>
    %168 = vector.shape_cast %167 : vector<16xf32> to vector<16x1xf32>
    %cst_56 = arith.constant 3.200000e+01 : f32
    %169 = vector.broadcast %cst_56 : f32 to vector<16x1xf32>
    %170 = arith.divf %168, %169 : vector<16x1xf32>
    %171 = vector.broadcast %163 : vector<16x1xf32> to vector<16x32xf32>
    %172 = arith.subf %159, %171 : vector<16x32xf32>
    %cst_57 = arith.constant 9.99999974E-6 : f32
    %173 = vector.broadcast %cst_57 : f32 to vector<16x1xf32>
    %174 = arith.addf %170, %173 : vector<16x1xf32>
    %175 = math.rsqrt %174 : vector<16x1xf32>
    %176 = vector.broadcast %175 : vector<16x1xf32> to vector<16x32xf32>
    %177 = arith.mulf %172, %176 : vector<16x32xf32>
    %178 = vector.broadcast %60 : vector<1x32xf32> to vector<16x32xf32>
    %179 = arith.mulf %177, %178 : vector<16x32xf32>
    %180 = vector.broadcast %61 : vector<1x32xf32> to vector<16x32xf32>
    %181 = arith.addf %179, %180 : vector<16x32xf32>
    %c160 = arith.constant 160 : index
    %c0_58 = arith.constant 0 : index
    %182 = vector.load %arg2[%c160, %c0_58] : memref<320x128xbf16, #tpu.memory_space<vmem>>, vector<32x96xbf16>
    %c192 = arith.constant 192 : index
    %c0_59 = arith.constant 0 : index
    %183 = vector.load %arg2[%c192, %c0_59] : memref<320x128xbf16, #tpu.memory_space<vmem>>, vector<32x32xbf16>
    %c224 = arith.constant 224 : index
    %c0_60 = arith.constant 0 : index
    %184 = vector.load %arg2[%c224, %c0_60] : memref<320x128xbf16, #tpu.memory_space<vmem>>, vector<32x64xbf16>
    %c256 = arith.constant 256 : index
    %c0_61 = arith.constant 0 : index
    %185 = vector.load %arg2[%c256, %c0_61] : memref<320x128xbf16, #tpu.memory_space<vmem>>, vector<64x32xbf16>
    %c16 = arith.constant 16 : index
    %c0_62 = arith.constant 0 : index
    %186 = vector.load %arg3[%c16, %c0_62] : memref<176x128xf32, #tpu.memory_space<vmem>>, vector<1x96xf32>
    %c17 = arith.constant 17 : index
    %c0_63 = arith.constant 0 : index
    %187 = vector.load %arg3[%c17, %c0_63] : memref<176x128xf32, #tpu.memory_space<vmem>>, vector<1x32xf32>
    %c18 = arith.constant 18 : index
    %c0_64 = arith.constant 0 : index
    %188 = vector.load %arg3[%c18, %c0_64] : memref<176x128xf32, #tpu.memory_space<vmem>>, vector<1x32xf32>
    %c19 = arith.constant 19 : index
    %c0_65 = arith.constant 0 : index
    %189 = vector.load %arg3[%c19, %c0_65] : memref<176x128xf32, #tpu.memory_space<vmem>>, vector<1x32xf32>
    %c20 = arith.constant 20 : index
    %c0_66 = arith.constant 0 : index
    %190 = vector.load %arg3[%c20, %c0_66] : memref<176x128xf32, #tpu.memory_space<vmem>>, vector<1x64xf32>
    %c21 = arith.constant 21 : index
    %c0_67 = arith.constant 0 : index
    %191 = vector.load %arg3[%c21, %c0_67] : memref<176x128xf32, #tpu.memory_space<vmem>>, vector<1x32xf32>
    %c22 = arith.constant 22 : index
    %c0_68 = arith.constant 0 : index
    %192 = vector.load %arg3[%c22, %c0_68] : memref<176x128xf32, #tpu.memory_space<vmem>>, vector<1x32xf32>
    %c23 = arith.constant 23 : index
    %c0_69 = arith.constant 0 : index
    %193 = vector.load %arg3[%c23, %c0_69] : memref<176x128xf32, #tpu.memory_space<vmem>>, vector<1x32xf32>
    %194 = arith.truncf %181 : vector<16x32xf32> to vector<16x32xbf16>
    %cst_70 = arith.constant dense<0.000000e+00> : vector<16x96xf32>
    %195 = tpu.matmul %194, %182, %cst_70 {dimension_numbers = #tpu.dot_dimension_numbers<[1], [0], [0], [1], [0, 0, 1, 1], [], []>} : vector<16x32xbf16>, vector<32x96xbf16>, vector<16x96xf32> -> vector<16x96xf32>
    %196 = vector.broadcast %186 : vector<1x96xf32> to vector<16x96xf32>
    %197 = arith.addf %195, %196 : vector<16x96xf32>
    %198 = vector.extract_strided_slice %197 {offsets = [0, 0], sizes = [16, 16], strides = [1, 1]} : vector<16x96xf32> to vector<16x16xf32>
    %199 = arith.truncf %198 : vector<16x16xf32> to vector<16x16xbf16>
    %200 = vector.extract_strided_slice %197 {offsets = [0, 32], sizes = [16, 16], strides = [1, 1]} : vector<16x96xf32> to vector<16x16xf32>
    %201 = arith.truncf %200 : vector<16x16xf32> to vector<16x16xbf16>
    %202 = vector.extract_strided_slice %197 {offsets = [0, 64], sizes = [16, 16], strides = [1, 1]} : vector<16x96xf32> to vector<16x16xf32>
    %203 = arith.truncf %202 : vector<16x16xf32> to vector<16x16xbf16>
    "tpu.trace_start"() <{level = 10 : i32, message = "qd,kd->qk"}> : () -> ()
    %cst_71 = arith.constant dense<0.000000e+00> : vector<16x16xf32>
    %204 = tpu.matmul %199, %201, %cst_71 {dimension_numbers = #tpu.dot_dimension_numbers<[1], [1], [0], [0], [0, 0, 1, 0], [], []>} : vector<16x16xbf16>, vector<16x16xbf16>, vector<16x16xf32> -> vector<16x16xf32>
    "tpu.trace_stop"() : () -> ()
    %cst_72 = arith.constant 2.500000e-01 : f32
    %205 = vector.broadcast %cst_72 : f32 to vector<16x16xf32>
    %206 = arith.mulf %204, %205 : vector<16x16xf32>
    %207 = arith.addf %206, %49 : vector<16x16xf32>
    %cst_73 = arith.constant dense<0xFF800000> : vector<16xf32>
    %208 = vector.multi_reduction <maximumf>, %207, %cst_73 [1] : vector<16x16xf32> to vector<16xf32>
    %209 = vector.shape_cast %208 : vector<16xf32> to vector<16x1xf32>
    %210 = vector.broadcast %209 : vector<16x1xf32> to vector<16x16xf32>
    %211 = arith.subf %207, %210 : vector<16x16xf32>
    %212 = math.exp %211 : vector<16x16xf32>
    %cst_74 = arith.constant dense<0.000000e+00> : vector<16xf32>
    %213 = vector.multi_reduction <add>, %212, %cst_74 [1] : vector<16x16xf32> to vector<16xf32>
    %214 = vector.shape_cast %213 : vector<16xf32> to vector<16x1xf32>
    %215 = tpu.reciprocal %214 {approx = true} : vector<16x1xf32> -> vector<16x1xf32>
    %216 = vector.broadcast %215 : vector<16x1xf32> to vector<16x16xf32>
    %217 = arith.mulf %212, %216 : vector<16x16xf32>
    %218 = arith.truncf %217 : vector<16x16xf32> to vector<16x16xbf16>
    %cst_75 = arith.constant dense<0.000000e+00> : vector<16x16xf32>
    %219 = tpu.matmul %218, %203, %cst_75 {dimension_numbers = #tpu.dot_dimension_numbers<[1], [0], [0], [1], [0, 0, 1, 1], [], []>} : vector<16x16xbf16>, vector<16x16xbf16>, vector<16x16xf32> -> vector<16x16xf32>
    %220 = vector.extract_strided_slice %197 {offsets = [0, 16], sizes = [16, 16], strides = [1, 1]} : vector<16x96xf32> to vector<16x16xf32>
    %221 = arith.truncf %220 : vector<16x16xf32> to vector<16x16xbf16>
    %222 = vector.extract_strided_slice %197 {offsets = [0, 48], sizes = [16, 16], strides = [1, 1]} : vector<16x96xf32> to vector<16x16xf32>
    %223 = arith.truncf %222 : vector<16x16xf32> to vector<16x16xbf16>
    %224 = vector.extract_strided_slice %197 {offsets = [0, 80], sizes = [16, 16], strides = [1, 1]} : vector<16x96xf32> to vector<16x16xf32>
    %225 = arith.truncf %224 : vector<16x16xf32> to vector<16x16xbf16>
    "tpu.trace_start"() <{level = 10 : i32, message = "qd,kd->qk"}> : () -> ()
    %cst_76 = arith.constant dense<0.000000e+00> : vector<16x16xf32>
    %226 = tpu.matmul %221, %223, %cst_76 {dimension_numbers = #tpu.dot_dimension_numbers<[1], [1], [0], [0], [0, 0, 1, 0], [], []>} : vector<16x16xbf16>, vector<16x16xbf16>, vector<16x16xf32> -> vector<16x16xf32>
    "tpu.trace_stop"() : () -> ()
    %cst_77 = arith.constant 2.500000e-01 : f32
    %227 = vector.broadcast %cst_77 : f32 to vector<16x16xf32>
    %228 = arith.mulf %226, %227 : vector<16x16xf32>
    %229 = arith.addf %228, %49 : vector<16x16xf32>
    %cst_78 = arith.constant dense<0xFF800000> : vector<16xf32>
    %230 = vector.multi_reduction <maximumf>, %229, %cst_78 [1] : vector<16x16xf32> to vector<16xf32>
    %231 = vector.shape_cast %230 : vector<16xf32> to vector<16x1xf32>
    %232 = vector.broadcast %231 : vector<16x1xf32> to vector<16x16xf32>
    %233 = arith.subf %229, %232 : vector<16x16xf32>
    %234 = math.exp %233 : vector<16x16xf32>
    %cst_79 = arith.constant dense<0.000000e+00> : vector<16xf32>
    %235 = vector.multi_reduction <add>, %234, %cst_79 [1] : vector<16x16xf32> to vector<16xf32>
    %236 = vector.shape_cast %235 : vector<16xf32> to vector<16x1xf32>
    %237 = tpu.reciprocal %236 {approx = true} : vector<16x1xf32> -> vector<16x1xf32>
    %238 = vector.broadcast %237 : vector<16x1xf32> to vector<16x16xf32>
    %239 = arith.mulf %234, %238 : vector<16x16xf32>
    %240 = arith.truncf %239 : vector<16x16xf32> to vector<16x16xbf16>
    %cst_80 = arith.constant dense<0.000000e+00> : vector<16x16xf32>
    %241 = tpu.matmul %240, %225, %cst_80 {dimension_numbers = #tpu.dot_dimension_numbers<[1], [0], [0], [1], [0, 0, 1, 1], [], []>} : vector<16x16xbf16>, vector<16x16xbf16>, vector<16x16xf32> -> vector<16x16xf32>
    %242 = tpu.concatenate %219, %241 in 1 : vector<16x16xf32>, vector<16x16xf32> -> vector<16x32xf32>
    %243 = arith.truncf %242 : vector<16x32xf32> to vector<16x32xbf16>
    %cst_81 = arith.constant dense<0.000000e+00> : vector<16x32xf32>
    %244 = tpu.matmul %243, %183, %cst_81 {dimension_numbers = #tpu.dot_dimension_numbers<[1], [0], [0], [1], [0, 0, 1, 1], [], []>} : vector<16x32xbf16>, vector<32x32xbf16>, vector<16x32xf32> -> vector<16x32xf32>
    %245 = vector.broadcast %187 : vector<1x32xf32> to vector<16x32xf32>
    %246 = arith.addf %244, %245 : vector<16x32xf32>
    %247 = arith.addf %181, %246 : vector<16x32xf32>
    %cst_82 = arith.constant dense<0.000000e+00> : vector<16xf32>
    %248 = vector.multi_reduction <add>, %247, %cst_82 [1] : vector<16x32xf32> to vector<16xf32>
    %249 = vector.shape_cast %248 : vector<16xf32> to vector<16x1xf32>
    %cst_83 = arith.constant 3.200000e+01 : f32
    %250 = vector.broadcast %cst_83 : f32 to vector<16x1xf32>
    %251 = arith.divf %249, %250 : vector<16x1xf32>
    %252 = vector.broadcast %251 : vector<16x1xf32> to vector<16x32xf32>
    %253 = arith.subf %247, %252 : vector<16x32xf32>
    %254 = arith.mulf %253, %253 : vector<16x32xf32>
    %cst_84 = arith.constant dense<0.000000e+00> : vector<16xf32>
    %255 = vector.multi_reduction <add>, %254, %cst_84 [1] : vector<16x32xf32> to vector<16xf32>
    %256 = vector.shape_cast %255 : vector<16xf32> to vector<16x1xf32>
    %cst_85 = arith.constant 3.200000e+01 : f32
    %257 = vector.broadcast %cst_85 : f32 to vector<16x1xf32>
    %258 = arith.divf %256, %257 : vector<16x1xf32>
    %259 = vector.broadcast %251 : vector<16x1xf32> to vector<16x32xf32>
    %260 = arith.subf %247, %259 : vector<16x32xf32>
    %cst_86 = arith.constant 9.99999974E-6 : f32
    %261 = vector.broadcast %cst_86 : f32 to vector<16x1xf32>
    %262 = arith.addf %258, %261 : vector<16x1xf32>
    %263 = math.rsqrt %262 : vector<16x1xf32>
    %264 = vector.broadcast %263 : vector<16x1xf32> to vector<16x32xf32>
    %265 = arith.mulf %260, %264 : vector<16x32xf32>
    %266 = vector.broadcast %188 : vector<1x32xf32> to vector<16x32xf32>
    %267 = arith.mulf %265, %266 : vector<16x32xf32>
    %268 = vector.broadcast %189 : vector<1x32xf32> to vector<16x32xf32>
    %269 = arith.addf %267, %268 : vector<16x32xf32>
    %270 = arith.truncf %269 : vector<16x32xf32> to vector<16x32xbf16>
    %cst_87 = arith.constant dense<0.000000e+00> : vector<16x64xf32>
    %271 = tpu.matmul %270, %184, %cst_87 {dimension_numbers = #tpu.dot_dimension_numbers<[1], [0], [0], [1], [0, 0, 1, 1], [], []>} : vector<16x32xbf16>, vector<32x64xbf16>, vector<16x64xf32> -> vector<16x64xf32>
    %272 = vector.broadcast %190 : vector<1x64xf32> to vector<16x64xf32>
    %273 = arith.addf %271, %272 : vector<16x64xf32>
    %cst_88 = arith.constant 5.000000e-01 : f32
    %274 = vector.broadcast %cst_88 : f32 to vector<16x64xf32>
    %275 = arith.mulf %274, %273 : vector<16x64xf32>
    %cst_89 = arith.constant 4.471500e-02 : f32
    %276 = vector.broadcast %cst_89 : f32 to vector<16x64xf32>
    %277 = arith.mulf %276, %273 : vector<16x64xf32>
    %278 = arith.mulf %277, %273 : vector<16x64xf32>
    %279 = arith.mulf %278, %273 : vector<16x64xf32>
    %280 = arith.addf %273, %279 : vector<16x64xf32>
    %cst_90 = arith.constant 0.797884583 : f32
    %281 = vector.broadcast %cst_90 : f32 to vector<16x64xf32>
    %282 = arith.mulf %281, %280 : vector<16x64xf32>
    %283 = math.tanh %282 : vector<16x64xf32>
    %cst_91 = arith.constant 1.000000e+00 : f32
    %284 = vector.broadcast %cst_91 : f32 to vector<16x64xf32>
    %285 = arith.addf %284, %283 : vector<16x64xf32>
    %286 = arith.mulf %275, %285 : vector<16x64xf32>
    %287 = arith.truncf %286 : vector<16x64xf32> to vector<16x64xbf16>
    %cst_92 = arith.constant dense<0.000000e+00> : vector<16x32xf32>
    %288 = tpu.matmul %287, %185, %cst_92 {dimension_numbers = #tpu.dot_dimension_numbers<[1], [0], [0], [1], [0, 0, 1, 1], [], []>} : vector<16x64xbf16>, vector<64x32xbf16>, vector<16x32xf32> -> vector<16x32xf32>
    %289 = vector.broadcast %191 : vector<1x32xf32> to vector<16x32xf32>
    %290 = arith.addf %288, %289 : vector<16x32xf32>
    %291 = arith.addf %269, %290 : vector<16x32xf32>
    %cst_93 = arith.constant dense<0.000000e+00> : vector<16xf32>
    %292 = vector.multi_reduction <add>, %291, %cst_93 [1] : vector<16x32xf32> to vector<16xf32>
    %293 = vector.shape_cast %292 : vector<16xf32> to vector<16x1xf32>
    %cst_94 = arith.constant 3.200000e+01 : f32
    %294 = vector.broadcast %cst_94 : f32 to vector<16x1xf32>
    %295 = arith.divf %293, %294 : vector<16x1xf32>
    %296 = vector.broadcast %295 : vector<16x1xf32> to vector<16x32xf32>
    %297 = arith.subf %291, %296 : vector<16x32xf32>
    %298 = arith.mulf %297, %297 : vector<16x32xf32>
    %cst_95 = arith.constant dense<0.000000e+00> : vector<16xf32>
    %299 = vector.multi_reduction <add>, %298, %cst_95 [1] : vector<16x32xf32> to vector<16xf32>
    %300 = vector.shape_cast %299 : vector<16xf32> to vector<16x1xf32>
    %cst_96 = arith.constant 3.200000e+01 : f32
    %301 = vector.broadcast %cst_96 : f32 to vector<16x1xf32>
    %302 = arith.divf %300, %301 : vector<16x1xf32>
    %303 = vector.broadcast %295 : vector<16x1xf32> to vector<16x32xf32>
    %304 = arith.subf %291, %303 : vector<16x32xf32>
    %cst_97 = arith.constant 9.99999974E-6 : f32
    %305 = vector.broadcast %cst_97 : f32 to vector<16x1xf32>
    %306 = arith.addf %302, %305 : vector<16x1xf32>
    %307 = math.rsqrt %306 : vector<16x1xf32>
    %308 = vector.broadcast %307 : vector<16x1xf32> to vector<16x32xf32>
    %309 = arith.mulf %304, %308 : vector<16x32xf32>
    %310 = vector.broadcast %192 : vector<1x32xf32> to vector<16x32xf32>
    %311 = arith.mulf %309, %310 : vector<16x32xf32>
    %312 = vector.broadcast %193 : vector<1x32xf32> to vector<16x32xf32>
    %313 = arith.addf %311, %312 : vector<16x32xf32>
    %314 = vector.extract_strided_slice %313 {offsets = [0, 0], sizes = [1, 32], strides = [1, 1]} : vector<16x32xf32> to vector<1x32xf32>
    %315 = vector.extract_strided_slice %313 {offsets = [8, 0], sizes = [1, 32], strides = [1, 1]} : vector<16x32xf32> to vector<1x32xf32>
    %316 = tpu.concatenate %314, %315 in 0 : vector<1x32xf32>, vector<1x32xf32> -> vector<2x32xf32>
    %c32_98 = arith.constant 32 : index
    %c0_99 = arith.constant 0 : index
    %317 = vector.load %arg3[%c32_98, %c0_99] : memref<176x128xf32, #tpu.memory_space<vmem>>, vector<32x128xf32>
    %c24 = arith.constant 24 : index
    %c0_100 = arith.constant 0 : index
    %318 = vector.load %arg3[%c24, %c0_100] : memref<176x128xf32, #tpu.memory_space<vmem>>, vector<1x128xf32>
    %cst_101 = arith.constant dense<0.000000e+00> : vector<2x128xf32>
    %319 = tpu.matmul %316, %317, %cst_101 {dimension_numbers = #tpu.dot_dimension_numbers<[1], [0], [0], [1], [0, 0, 1, 1], [], []>} : vector<2x32xf32>, vector<32x128xf32>, vector<2x128xf32> -> vector<2x128xf32>
    %320 = vector.broadcast %318 : vector<1x128xf32> to vector<2x128xf32>
    %321 = arith.addf %319, %320 : vector<2x128xf32>
    %c0_102 = arith.constant 0 : index
    %c0_103 = arith.constant 0 : index
    %322 = vector.load %arg4[%c0_102, %c0_103] : memref<2x128xf32, #tpu.memory_space<vmem>>, vector<2x128xf32>
    tpu.vector_store %arg4[%c0_102, %c0_103], %321 {strides = array<i32>} : memref<2x128xf32, #tpu.memory_space<vmem>>, vector<2x128xf32>,
    return
  }
}

</mosaic_0001>

<bundles_post_ra>
// kernel: forward.1
= control target key start
LH: loop header
LB: loop body
LE: loop exit
PB: predicated region body
PF: predicated region fallthrough
CT: control target
= control target key end

     0   :  { %9 = vsyncpa [#allocation3], 0  ;;  %s2339_s0 = inlined_call_operand.vmem [shape: s32[16,1], index: 0, kind: input, shape index: {}]   ;;  %s2340_s1 = inlined_call_operand.vmem [shape: s32[1,16], index: 1, kind: input, shape index: {}]   ;;  %s2341_s2 = inlined_call_operand.hbm [shape: bf16[320,128], index: 2, kind: input, shape index: {}]   ;;  %s2342_s3 = inlined_call_operand.hbm [shape: f32[176,128], index: 3, kind: input, shape index: {}]   ;;  %s2343_s4 = inlined_call_operand.hbm [shape: f32[2,128], index: 4, kind: output, shape index: {}]  }
   0x1   :  { %10 = vsyncpa [#allocation6], 0 }
   0x2   :  { %11 = vsyncpa [#allocation4], 0  ;;  %s2073_s15 = smov [#allocation2]  }
   0x3   :  { %s21_s16 = sshll.u32 %s2073_s15, 4  ;;  %s22_s16 = int_to_ptr.vmem [resolvable:$true] %s21_s16 }
   0x4   :  { %s2015_s17 = scalar_lea.vmem %s22_s16, 2560  ;;  %p2020_p1 = scmp.lt.s32.totalorder %s22_s16, %s22_s16 }
   0x5   :  { %p2016_p0 = scmp.ne.s32.totalorder %s22_s16, %s2015_s17  ;;  %p2021_p2 = scmp.lt.s32.totalorder %s2015_s17, %s2015_s17 }
   0x7   :  { %p2022_p3 = por %p2021_p2, %p2020_p1 }
   0x9   :  { %p2023_p4 = pnand %p2022_p3, %p2016_p0 }
   0xb   :  { %2026 = shalt.err (!%p2023_p4)
}
   0xc   :  { %s2074_s18 = smov 64   ;;  %s2075_s19 = smov 4  }
   0xd   :  { %27 = dma.hbm_to_vmem [thread:$0]  %s2341_s2, 2560, %s22_s16, [#allocation3], %s2074_s18, %s2074_s18, %s2075_s19  }
   0xe   :  { %s2076_s22 = smov [#allocation5]  }
   0xf   :  { %s33_s23 = sshll.u32 %s2076_s22, 4  ;;  %s34_s23 = int_to_ptr.vmem [resolvable:$true] %s33_s23 }
  0x10   :  { %s2035_s24 = scalar_lea.vmem %s34_s23, 2816  ;;  %p2040_p6 = scmp.lt.s32.totalorder %s34_s23, %s34_s23 }
  0x11   :  { %p2036_p5 = scmp.ne.s32.totalorder %s34_s23, %s2035_s24  ;;  %p2041_p7 = scmp.lt.s32.totalorder %s2035_s24, %s2035_s24 }
  0x13   :  { %p2042_p8 = por %p2041_p7, %p2040_p6 }
  0x15   :  { %p2043_p9 = pnand %p2042_p8, %p2036_p5 }
  0x17   :  { %2046 = shalt.err (!%p2043_p9)
}
  0x18   :  { %s2077_s25 = smov 128   ;;  %s2078_s26 = smov 8  }
  0x19   :  { %39 = dma.hbm_to_vmem [thread:$0]  %s2342_s3, 2816, %s34_s23, [#allocation6], %s2077_s25, %s2077_s25, %s2078_s26  }
  0x1a   :  { %2067 = dma.done.wait [#allocation3], 2560  }
  0x1b   :  { %2068 = vsyncadd [#allocation3], 4294964736 }
  0x1c   :  { %2069 = dma.done.wait [#allocation6], 2816  }
  0x1d   :  { %2070 = vsyncadd [#allocation6], 4294964480  ;;  %v50_v0 = vlaneseq  ;;  %v2079_v1 = vmov 0   ;;  %vm85_vm0 = vcmask 1043456   ;;  %v2080_v8 = vmov 0.0   ;;  %v47_v11 = vld [vmem:[%s2339_s0] sm:$0xff] }
  0x1e   :  { %1916 = vset.pattern.permute.xlu0 %v2079_v1  ;;  %1769 = vmatprep.subr.bf16.mxu1 %v2080_v8  ;;  %v49_v9 = vld [vmem:[%s2340_s1] sm:$0x1]  ;;  %v76_v12 = vld [vmem:[#allocation5 + $0xa8] sm:$0xf]  ;;  %v74_v17 = vld [vmem:[#allocation5 + $0x98] sm:$0xff]  ;;  %vm78_vm7 = vcmask 818176  }
  0x1f   :  { %v207_v2 = vshrl.u32 %v50_v0, 7  ;;  %v2122_v3 = vand.u32 127, %v50_v0  ;;  %vm214_vm1 = vcmp.gt.s32.totalorder %v49_v9, 0  ;;  %53 = vperm.xlu0 %1916, %v47_v11   ;;  %v75_v13 = vld [vmem:[#allocation5 + $0xa0] sm:$0xff]  ;;  %v48_v15 = vld [vmem:[%s2339_s0 + $0x8] sm:$0xff]  ;;  %1740 = vmatprep.subr.msk.mxu0 %vm85_vm0, %v76_v12  ;;  %v73_v18 = vld [vmem:[#allocation5 + $0x90] sm:$0xff] }
  0x20   :  { %v215_v14 = vsel %vm214_vm1, 1, %v2079_v1  ;;  %1741 = vmatpush3.msk.msra.mxu0 %vm85_vm0, %v76_v12  ;;  %v72_v19 = vld [vmem:[#allocation5 + $0x88] sm:$0xff]  ;;  %v71_v22 = vld [vmem:[#allocation5 + $0x80] sm:$0xff]  ;;  %v70_v23 = vld [vmem:[#allocation5 + $0x78] sm:$0xff]  ;;  %vm166_vm10 = vcmask 261120   ;;  %vm2081_vm11 = vmmov 0  }
  0x21   :  { %v208_v4 = vadd.s32 8, %v207_v2  ;;  %v209_v5 = vshra.s32 %v207_v2, 3  ;;  %v211_v6 = vshra.s32 %v2122_v3, 3  ;;  %v218_v7 = vsub.s32 0, %v207_v2  ;;  %1742 = vmatprep.subr.mxu0 %v75_v13  ;;  %v69_v24 = vld [vmem:[#allocation5 + $0x70] sm:$0xff]  ;;  %v68_v25 = vld [vmem:[#allocation5 + $0x68] sm:$0xff]  ;;  %1773 = vmatprep.mubr.msk.bf16.mxu1 %vm2081_vm11, %v2080_v8 }
  0x22   :  { %1743 = vmatpush3.msra.mxu0 %v75_v13  ;;  %v67_v26 = vld [vmem:[#allocation5 + $0x60] sm:$0xff]  ;;  %v66_v27 = vld [vmem:[#allocation5 + $0x58] sm:$0xff]  ;;  %v65_v28 = vld [vmem:[#allocation5 + $0x50] sm:$0xff]  ;;  %s2082_s0 = smov 96   ;;  %vm318_vm12 = vcmask 130048   ;;  %s2084_s1 = smov 80  }
  0x23   :  { %v210_v10 = vshra.s32 %v208_v4, 3  ;;  %vm212_vm2 = vcmp.eq.s32.totalorder %v209_v5, %v211_v6  ;;  %v219_v16 = vrot.slane %v215_v14, %v218_v7  ;;  %56 = vperm.xlu0 %1916, %v48_v15   ;;  %1744 = vmatprep.subr.mxu0 %v74_v17  ;;  %v64_v29 = vld [vmem:[#allocation5 + $0x48] sm:$0xff]  ;;  %v77_v35 = vld [vmem:[#allocation5 + $0x40] sm:$0xff]  ;;  %s2085_s7 = smov 112   ;;  %s2086_s8 = smov 48   ;;  %vm784_vm13 = vcmask 523264  }
  0x24   :  { %1745 = vmatpush3.msra.mxu0 %v74_v17  ;;  %v1927_v51 = vld [vmem:[#allocation2 + $0x8] sm:$0xff]   ;;  %v1928_v52 = vld [vmem:[#allocation2] sm:$0xff]   ;;  %v2083_v17 = vmov -1e+09   ;;  %s2087_s9 = smov 16   ;;  %vm1514_vm14 = vcmask 1040384  }
  0x25   :  { %vm213_vm3 = vcmp.eq.s32.totalorder %v210_v10, %v211_v6  ;;  %vm220_vm4 = vcmp.eq.s32.totalorder %v219_v16, 1  ;;  %1746 = vmatprep.subr.mxu0 %v73_v18  ;;  %1770 = vmatpush3.bf16.msra.mxu1 %v1927_v51  ;;  %v1620_v61 = vld [vmem:[#allocation5] ss:$0 sm:$0xff]  ;;  %v1621_v1 = vld [vmem:[#allocation5 + $0x1] ss:$0 sm:$0xff]  ;;  %s2088_s10 = smov [#allocation7]  }
  0x26   :  { %vm2135_vm5 = vmand %vm212_vm2, %vm220_vm4  ;;  %1747 = vmatpush3.msra.mxu0 %v73_v18  ;;  %1771 = vmatprep.subr.bf16.mxu1 %v2080_v8  ;;  %v1622_v7 = vld [vmem:[#allocation5 + $0x8] ss:$0 sm:$0xff]  ;;  %s1605_s11 = sshll.u32 %s2088_s10, 4  ;;  %s1606_s11 = int_to_ptr.vmem [resolvable:$true] %s1605_s11 }
  0x27   :  { %vm2139_vm6 = vmand %vm213_vm3, %vm220_vm4  ;;  %1748 = vmatprep.subr.mxu0 %v72_v19  ;;  %v2179_v18 = vsel %vm2135_vm5, 0.0, %v2083_v17  ;;  %s2047_s12 = scalar_lea.vmem %s1606_s11, 32  ;;  %p2052_p11 = scmp.lt.s32.totalorder %s1606_s11, %s1606_s11 }
  0x28   :  { %1749 = vmatpush3.msra.mxu0 %v72_v19  ;;  %p2048_p10 = scmp.ne.s32.totalorder %s1606_s11, %s2047_s12  ;;  %p2053_p12 = scmp.lt.s32.totalorder %s2047_s12, %s2047_s12 }
  0x29   :  { %1750 = vmatprep.subr.mxu0 %v71_v22  ;;  %1772 = vmatpush3.bf16.msra.mxu1 %v1928_v52 }
  0x2a   :  { %1751 = vmatpush3.msra.mxu0 %v71_v22  ;;  %1777 = vmatprep.subr.bf16.mxu1 %v2080_v8  ;;  %p2054_p13 = por %p2053_p12, %p2052_p11 }
  0x2b   :  { %1752 = vmatprep.subr.mxu0 %v70_v23 }
  0x2c   :  { %1753 = vmatpush3.msra.mxu0 %v70_v23  ;;  %p2055_p0 = pnand %p2054_p13, %p2048_p10 }
  0x2d   :  { %1754 = vmatprep.subr.mxu0 %v69_v24 }
  0x2e   :  { %1755 = vmatpush3.msra.mxu0 %v69_v24 }
  0x2f   :  { %1756 = vmatprep.subr.mxu0 %v68_v25 }
  0x30   :  { %1757 = vmatpush3.msra.mxu0 %v68_v25  ;;  %v2184_v25 = vsel %vm2139_vm6, 0.0, %v2083_v17 }
  0x31   :  { %1758 = vmatprep.subr.mxu0 %v67_v26 }
  0x32   :  { %1759 = vmatpush3.msra.mxu0 %v67_v26 }
  0x33   :  { %1760 = vmatprep.subr.mxu0 %v66_v27 }
  0x34   :  { %1761 = vmatpush3.msra.mxu0 %v66_v27 }
  0x35   :  { %1762 = vmatprep.subr.mxu0 %v65_v28 }
  0x36   :  { %1763 = vmatpush3.msra.mxu0 %v65_v28 }
  0x37   :  { %1764 = vmatprep.subr.mxu0 %v64_v29 }
  0x38   :  { %1765 = vmatpush3.msra.mxu0 %v64_v29 }
  0x39   :  { %1795 = vmatprep.subr.bf16.mxu0 %v2080_v8 }
  0x9a   :  { %v54_v30 = vpop.permute.xlu0 %53 }
  0x9b   :  { %vm58_vm8 = vcmp.eq.s32.totalorder %v2122_v3, %v54_v30 }
  0x9c   :  { %v1615_v31 = vsel %vm58_vm8, 1.0, %v2080_v8 }
  0x9d   :  { %1766 = vmatprep.mubr.msk.f32.mxu0 %vm78_vm7, %v1615_v31 }
  0x9e   :  { %v57_v32 = vpop.permute.xlu0 %56 }
  0x9f   :  { %vm59_vm9 = vcmp.eq.s32.totalorder %v2122_v3, %v57_v32 }
  0xa0   :  { %v1616_v33 = vsel %vm59_vm9, 1.0, %v2080_v8 }
  0xa1   :  { %1767 = vmatmul.mubr.msk.f32.vlgmr.msra.gmra.mxu0 %vm78_vm7, %v1616_v33 }
  0xa2   :  { %1797 = vmatprep.mubr.msk.bf16.mxu0 %vm2081_vm11, %v2080_v8 }
 0x161   :  { %v1768_v34 = vpop.f32.mrf.mxu0 }
 0x162   :  { %v161_v38 = vadd.f32 %v1768_v34, %v77_v35 }
 0x163   :  { %v155_v36 = vpop.f32.mrf.mxu0 }
 0x164   :  { %v156_v37 = vadd.f32 %v155_v36, %v77_v35  ;;  %v170_v40 = vsel %vm166_vm10, %v161_v38, 0.0 }
 0x166   :  { %v167_v39 = vsel %vm166_vm10, %v156_v37, 0.0 }
 0x167   :  { %168 = vadd.xlane.f32.xlu1 %v167_v39 }
 0x16b   :  { %171 = vadd.xlane.f32.xlu1 %v170_v40 }
 0x1f0   :  { %v169_v41 = vpop.xlane.xlu1 %168 }
 0x1f1   :  { %v174_v42 = vmul.f32 0.03125, %v169_v41 }
 0x1f3   :  { %v176_v43 = vsub.f32 %v156_v37, %v174_v42 }
 0x1f4   :  { %v172_v44 = vpop.xlane.xlu1 %171 }
 0x1f5   :  { %v175_v45 = vmul.f32 0.03125, %v172_v44  ;;  %v178_v46 = vmul.f32 %v176_v43, %v176_v43 }
 0x1f7   :  { %v177_v47 = vsub.f32 %v161_v38, %v175_v45  ;;  %v180_v48 = vsel %vm166_vm10, %v178_v46, 0.0 }
 0x1f8   :  { %181 = vadd.xlane.f32.xlu0 %v180_v48 }
 0x1f9   :  { %v179_v49 = vmul.f32 %v177_v47, %v177_v47 }
 0x1fb   :  { %v183_v50 = vsel %vm166_vm10, %v179_v49, 0.0 }
 0x1fc   :  { %184 = vadd.xlane.f32.xlu1 %v183_v50 }
 0x281   :  { %v182_v53 = vpop.xlane.xlu0 %181 }
 0x282   :  { %v186_v54 = vmul.f32 0.03125, %v182_v53 }
 0x284   :  { %v188_v55 = vadd.f32 1e-05, %v186_v54 }
 0x285   :  { %v185_v56 = vpop.xlane.xlu1 %184 }
 0x286   :  { %1947 = vrsqrt.f32 %v188_v55  ;;  %v187_v57 = vmul.f32 0.03125, %v185_v56 }
 0x288   :  { %v189_v58 = vadd.f32 1e-05, %v187_v57 }
 0x28a   :  { %1949 = vrsqrt.f32 %v189_v58 }
 0x293   :  { %v1948_v59 = vpop.eup %1947 }
 0x294   :  { %v192_v60 = vmul.f32 %v1948_v59, %v176_v43 }
 0x296   :  { %v198_v0 = vmul.f32 %v1620_v61, %v192_v60 }
 0x297   :  { %v1950_v62 = vpop.eup %1949 }
 0x298   :  { %v193_v63 = vmul.f32 %v1950_v62, %v177_v47  ;;  %v2158_v3 = vadd.f32 %v1621_v1, %v198_v0 }
 0x29a   :  { %v199_v2 = vmul.f32 %v1620_v61, %v193_v63 }
 0x29c   :  { %v2160_v4 = vadd.f32 %v1621_v1, %v199_v2 }
 0x29e   :  { %v253_v5 = vpack.c.bf16 %v2160_v4, %v2158_v3 }
 0x2a0   :  { %1774 = vmatmul.mubr.msk.bf16.vlgmr.msra.gmra.mxu1 %vm166_vm10, %v253_v5 }
 0x2a1   :  { %1779 = vmatprep.mubr.msk.bf16.mxu1 %vm2081_vm11, %v2080_v8 }
 0x360   :  { %v307_v6 = vpop.f32.mrf.mxu1 }
 0x361   :  { %v308_v11 = vadd.f32 %v1622_v7, %v307_v6 }
 0x362   :  { %v1775_v9 = vpop.f32.mrf.mxu1 }
 0x364   :  { %v310_v10 = vpop.f32.mrf.mxu1 }
 0x365   :  { %v311_v12 = vadd.f32 %v1622_v7, %v310_v10 }
 0x366   :  { %v1776_v13 = vpop.f32.mrf.mxu1 }
 0x367   :  { %v2167_v14 = vpack.c.bf16 %v311_v12, %v308_v11 }
 0x369   :  { %316 = vrot.lane.b32.xlu1 %v2167_v14, %s2082_s0 }
 0x3db   :  { %v317_v15 = vpop.permute.xlu1 %316 }
 0x3dc   :  { %v323_v16 = vsel %vm318_vm12, %v317_v15, 0 }
 0x3dd   :  { %1778 = vmatpush3.bf16.xpose.msra.mxu1 %v323_v16 }
 0x3de   :  { %1783 = vmatprep.subr.bf16.mxu1 %v2080_v8 }
 0x3e4   :  { %1780 = vmatmul.mubr.msk.bf16.vlgmr.msra.gmra.mxu1 %vm318_vm12, %v2167_v14 }
 0x3e5   :  { %1785 = vmatprep.mubr.msk.bf16.mxu1 %vm2081_vm11, %v2080_v8 }
 0x4a4   :  { %v359_v19 = vpop.f32.mrf.mxu1 }
 0x4a5   :  { %v366_v22 = vmul.f32 0.25, %v359_v19 }
 0x4a6   :  { %v1781_v23 = vpop.f32.mrf.mxu1 }
 0x4a7   :  { %v368_v24 = vadd.f32 %v366_v22, %v2179_v18 }
 0x4a8   :  { %v362_v26 = vpop.f32.mrf.mxu1 }
 0x4a9   :  { %v367_v27 = vmul.f32 0.25, %v362_v26  ;;  %v370_v28 = vsel %vm318_vm12, %v368_v24, -inf }
 0x4aa   :  { %371 = vmax.xlane.f32.xlu1 %v370_v28  ;;  %v1782_v29 = vpop.f32.mrf.mxu1 }
 0x4ab   :  { %v369_v30 = vadd.f32 %v367_v27, %v2184_v25  ;;  %v1929_v27 = vld [vmem:[#allocation2 + $0x18] sm:$0xff]  }
 0x4ad   :  { %v373_v20 = vsel %vm318_vm12, %v369_v30, -inf }
 0x4ae   :  { %374 = vmax.xlane.f32.xlu0 %v373_v20 }
 0x4bb   :  { %442 = vrot.lane.b32.xlu1 %v2167_v14, %s2084_s1 }
 0x533   :  { %v372_v31 = vpop.xlane.xlu1 %371 }
 0x534   :  { %v376_v32 = vsub.f32 %v368_v24, %v372_v31 }
 0x536   :  { %v378_v21 = vmul.f32 1.442695, %v376_v32 }
 0x537   :  { %v375_v33 = vpop.xlane.xlu0 %374  ;;  %v443_v47 = vpop.permute.xlu1 %442 }
 0x538   :  { %1951 = vpow2.f32 %v378_v21  ;;  %v377_v34 = vsub.f32 %v369_v30, %v375_v33  ;;  %v448_v49 = vsel %vm318_vm12, %v443_v47, 0 }
 0x53a   :  { %v380_v35 = vmul.f32 1.442695, %v377_v34 }
 0x53c   :  { %1953 = vpow2.f32 %v380_v35 }
 0x545   :  { %v1952_v36 = vpop.eup %1951 }
 0x546   :  { %v382_v37 = vsel %vm318_vm12, %v1952_v36, 0.0 }
 0x547   :  { %383 = vadd.xlane.f32.xlu0 %v382_v37  ;;  %v1630_v37 = vld [vmem:[#allocation5 + $0x9] ss:$0 sm:$0xff] }
 0x549   :  { %v1954_v38 = vpop.eup %1953 }
 0x54a   :  { %v385_v39 = vsel %vm318_vm12, %v1954_v38, 0.0 }
 0x54b   :  { %386 = vadd.xlane.f32.xlu0 %v385_v39 }
 0x561   :  { %393 = vrot.lane.b32.xlu0 %v2167_v14, %s2074_s18 }
 0x565   :  { %440 = vrot.lane.b32.xlu0 %v2167_v14, %s2085_s7 }
 0x5d0   :  { %v384_v40 = vpop.xlane.xlu0 %383 }
 0x5d1   :  { %1955 = vrcp.f32 %v384_v40 }
 0x5d4   :  { %v387_v41 = vpop.xlane.xlu0 %386 }
 0x5d5   :  { %1957 = vrcp.f32 %v387_v41 }
 0x5d8   :  { %v394_v42 = vpop.permute.xlu0 %393 }
 0x5d9   :  { %1784 = vmatpush3.bf16.msra.mxu1 %v394_v42 }
 0x5da   :  { %1789 = vmatprep.subr.bf16.mxu1 %v2080_v8 }
 0x5dc   :  { %v441_v50 = vpop.permute.xlu0 %440 }
 0x5de   :  { %v1956_v43 = vpop.eup %1955 }
 0x5df   :  { %v390_v45 = vmul.f32 %v1956_v43, %v1952_v36 }
 0x5e2   :  { %v1958_v44 = vpop.eup %1957 }
 0x5e3   :  { %v391_v46 = vmul.f32 %v1958_v44, %v1954_v38 }
 0x5e5   :  { %v392_v48 = vpack.c.bf16 %v391_v46, %v390_v45 }
 0x5e7   :  { %1786 = vmatmul.mubr.msk.bf16.vlgmr.msra.gmra.mxu1 %vm318_vm12, %v392_v48 }
 0x5e8   :  { %1790 = vmatpush3.bf16.xpose.msra.mxu1 %v448_v49  ;;  %1791 = vmatprep.mubr.msk.bf16.mxu1 %vm2081_vm11, %v2080_v8 }
 0x5e9   :  { %1809 = vmatprep.subr.bf16.mxu1 %v2080_v8 }
 0x5ef   :  { %1792 = vmatmul.mubr.msk.bf16.vlgmr.msra.gmra.mxu1 %vm318_vm12, %v441_v50 }
 0x5f0   :  { %1813 = vmatprep.mubr.msk.bf16.mxu1 %vm2081_vm11, %v2080_v8 }
 0x6a7   :  { %v2206_v51 = vpop.f32.mrf.mxu1 }
 0x6a9   :  { %v1787_v52 = vpop.f32.mrf.mxu1 }
 0x6ab   :  { %v436_v53 = vpop.f32.mrf.mxu1 }
 0x6ad   :  { %v1788_v54 = vpop.f32.mrf.mxu1 }
 0x6af   :  { %v484_v55 = vpop.f32.mrf.mxu1 }
 0x6b0   :  { %v491_v56 = vmul.f32 0.25, %v484_v55 }
 0x6b1   :  { %v1793_v57 = vpop.f32.mrf.mxu1 }
 0x6b2   :  { %v493_v58 = vadd.f32 %v491_v56, %v2179_v18  ;;  %v1931_v57 = vld [vmem:[#allocation2 + $0x28] sm:$0xff]  }
 0x6b3   :  { %v487_v59 = vpop.f32.mrf.mxu1  ;;  %1810 = vmatpush3.bf16.msra.mxu1 %v1931_v57 }
 0x6b4   :  { %v492_v60 = vmul.f32 0.25, %v487_v59  ;;  %v495_v61 = vsel %vm318_vm12, %v493_v58, -inf  ;;  %1811 = vmatprep.subr.bf16.mxu1 %v2080_v8 }
 0x6b5   :  { %496 = vmax.xlane.f32.xlu0 %v495_v61  ;;  %v1794_v62 = vpop.f32.mrf.mxu1 }
 0x6b6   :  { %v494_v63 = vadd.f32 %v492_v60, %v2184_v25 }
 0x6b8   :  { %v498_v0 = vsel %vm318_vm12, %v494_v63, -inf }
 0x6b9   :  { %499 = vmax.xlane.f32.xlu1 %v498_v0 }
 0x73e   :  { %v497_v1 = vpop.xlane.xlu0 %496 }
 0x73f   :  { %v501_v2 = vsub.f32 %v493_v58, %v497_v1 }
 0x741   :  { %v503_v5 = vmul.f32 1.442695, %v501_v2  ;;  %v1634_v2 = vld [vmem:[#allocation5 + $0xa] ss:$0 sm:$0xff] }
 0x742   :  { %v500_v6 = vpop.xlane.xlu1 %499 }
 0x743   :  { %1959 = vpow2.f32 %v503_v5  ;;  %v502_v7 = vsub.f32 %v494_v63, %v500_v6 }
 0x745   :  { %v505_v9 = vmul.f32 1.442695, %v502_v7 }
 0x747   :  { %1961 = vpow2.f32 %v505_v9  ;;  %v1635_v9 = vld [vmem:[#allocation5 + $0xb] ss:$0 sm:$0xff] }
 0x750   :  { %v1960_v10 = vpop.eup %1959 }
 0x751   :  { %v507_v11 = vsel %vm318_vm12, %v1960_v10, 0.0 }
 0x752   :  { %508 = vadd.xlane.f32.xlu0 %v507_v11 }
 0x754   :  { %v1962_v12 = vpop.eup %1961 }
 0x755   :  { %v510_v13 = vsel %vm318_vm12, %v1962_v12, 0.0 }
 0x756   :  { %511 = vadd.xlane.f32.xlu0 %v510_v13 }
 0x76c   :  { %518 = vrot.lane.b32.xlu0 %v2167_v14, %s2086_s8  ;;  %v1930_v14 = vld [vmem:[#allocation2 + $0x10] sm:$0xff]  }
 0x7db   :  { %v509_v15 = vpop.xlane.xlu0 %508 }
 0x7dc   :  { %1963 = vrcp.f32 %v509_v15  ;;  %v1933_v15 = vld [vmem:[#allocation2 + $0x48] sm:$0xff]  }
 0x7df   :  { %v512_v16 = vpop.xlane.xlu0 %511 }
 0x7e0   :  { %1965 = vrcp.f32 %v512_v16  ;;  %v1934_v16 = vld [vmem:[#allocation2 + $0x40] sm:$0xff]  }
 0x7e3   :  { %v519_v17 = vpop.permute.xlu0 %518 }
 0x7e4   :  { %1796 = vmatpush3.bf16.msra.mxu0 %v519_v17  ;;  %v1935_v17 = vld [vmem:[#allocation2 + $0x38] sm:$0xff]  }
 0x7e5   :  { %1801 = vmatprep.subr.bf16.mxu0 %v2080_v8 }
 0x7e9   :  { %v1964_v19 = vpop.eup %1963 }
 0x7ea   :  { %v515_v23 = vmul.f32 %v1964_v19, %v1960_v10  ;;  %v1936_v19 = vld [vmem:[#allocation2 + $0x30] sm:$0xff]  }
 0x7ed   :  { %v1966_v22 = vpop.eup %1965 }
 0x7ee   :  { %v516_v24 = vmul.f32 %v1966_v22, %v1962_v12  ;;  %v1636_v22 = vld [vmem:[#allocation5 + $0xc] ss:$0 sm:$0xff] }
 0x7f0   :  { %v517_v26 = vpack.c.bf16 %v516_v24, %v515_v23 }
 0x7f2   :  { %1798 = vmatmul.mubr.msk.bf16.vlgmr.msra.gmra.mxu0 %vm318_vm12, %v517_v26 }
 0x7f3   :  { %1805 = vmatprep.mubr.msk.bf16.mxu0 %vm2081_vm11, %v2080_v8  ;;  %1802 = vmatpush3.bf16.msra.mxu0 %v1929_v27 }
 0x7f4   :  { %1803 = vmatprep.subr.bf16.mxu0 %v2080_v8 }
 0x7f7   :  { %1804 = vmatpush3.bf16.msra.mxu0 %v1930_v14 }
 0x7f8   :  { %1817 = vmatprep.subr.bf16.mxu0 %v2080_v8 }
 0x8b2   :  { %v558_v28 = vpop.f32.mrf.mxu0 }
 0x8b4   :  { %v1799_v29 = vpop.f32.mrf.mxu0 }
 0x8b6   :  { %v561_v30 = vpop.f32.mrf.mxu0 }
 0x8b7   :  { %v1917_v20 = vpack.i.bf16 %v561_v30, %v558_v28 }
 0x8b8   :  { %v1800_v31 = vpop.f32.mrf.mxu0 }
 0x8b9   :  { %1918 = vrot.lane.b32.xlu1 %v1917_v20, %s2087_s9 }
 0x92b   :  { %v1919_v32 = vpop.permute.xlu1 %1918 }
 0x92c   :  { %v1921_v21 = vunpack.i.h.bf16 %v1919_v32  ;;  %v1920_v33 = vunpack.i.l.bf16 %v1919_v32 }
 0x92e   :  { %v574_v34 = vsel %vm318_vm12, %v436_v53, %v1921_v21  ;;  %v573_v35 = vsel %vm318_vm12, %v2206_v51, %v1920_v33 }
 0x92f   :  { %v575_v36 = vpack.c.bf16 %v574_v34, %v573_v35 }
 0x931   :  { %1806 = vmatmul.mubr.msk.bf16.vlgmr.msra.gmra.mxu0 %vm166_vm10, %v575_v36 }
 0x932   :  { %1825 = vmatprep.mubr.msk.bf16.mxu0 %vm2081_vm11, %v2080_v8  ;;  %1818 = vmatpush3.bf16.msra.mxu0 %v1933_v15  ;;  %v1646_v15 = vld [vmem:[#allocation5 + $0xe] ss:$0 sm:$0xff] }
 0x933   :  { %1819 = vmatprep.subr.bf16.mxu0 %v2080_v8 }
 0x936   :  { %1820 = vmatpush3.bf16.msra.mxu0 %v1934_v16 }
 0x937   :  { %1821 = vmatprep.subr.bf16.mxu0 %v2080_v8 }
 0x93a   :  { %1822 = vmatpush3.bf16.msra.mxu0 %v1935_v17 }
 0x93b   :  { %1823 = vmatprep.subr.bf16.mxu0 %v2080_v8 }
 0x93e   :  { %1824 = vmatpush3.bf16.msra.mxu0 %v1936_v19 }
 0x93f   :  { %1843 = vmatprep.subr.bf16.mxu0 %v2080_v8 }
 0x9f1   :  { %v629_v38 = vpop.f32.mrf.mxu0 }
 0x9f2   :  { %v630_v39 = vadd.f32 %v1630_v37, %v629_v38 }
 0x9f3   :  { %v1807_v40 = vpop.f32.mrf.mxu0 }
 0x9f4   :  { %v636_v41 = vadd.f32 %v630_v39, %v2158_v3 }
 0x9f5   :  { %v632_v42 = vpop.f32.mrf.mxu0 }
 0x9f6   :  { %v633_v43 = vadd.f32 %v1630_v37, %v632_v42  ;;  %v638_v44 = vsel %vm166_vm10, %v636_v41, 0.0 }
 0x9f7   :  { %639 = vadd.xlane.f32.xlu1 %v638_v44  ;;  %v1808_v45 = vpop.f32.mrf.mxu0 }
 0x9f8   :  { %v637_v46 = vadd.f32 %v633_v43, %v2160_v4  ;;  %v1932_v4 = vld [vmem:[#allocation2 + $0x20] sm:$0xff]  }
 0x9f9   :  { %1812 = vmatpush3.bf16.msra.mxu1 %v1932_v4 }
 0x9fa   :  { %v641_v47 = vsel %vm166_vm10, %v637_v46, 0.0  ;;  %1829 = vmatprep.subr.bf16.mxu1 %v2080_v8 }
 0x9fb   :  { %642 = vadd.xlane.f32.xlu0 %v641_v47 }
 0xa80   :  { %v640_v48 = vpop.xlane.xlu1 %639 }
 0xa81   :  { %v644_v49 = vmul.f32 0.03125, %v640_v48 }
 0xa83   :  { %v646_v50 = vsub.f32 %v636_v41, %v644_v49 }
 0xa84   :  { %v643_v51 = vpop.xlane.xlu0 %642 }
 0xa85   :  { %v645_v52 = vmul.f32 0.03125, %v643_v51  ;;  %v648_v53 = vmul.f32 %v646_v50, %v646_v50 }
 0xa87   :  { %v647_v54 = vsub.f32 %v637_v46, %v645_v52  ;;  %v650_v3 = vsel %vm166_vm10, %v648_v53, 0.0  ;;  %v1640_v46 = vld [vmem:[#allocation5 + $0xd] ss:$0 sm:$0xff] }
 0xa88   :  { %651 = vadd.xlane.f32.xlu0 %v650_v3 }
 0xa89   :  { %v649_v55 = vmul.f32 %v647_v54, %v647_v54 }
 0xa8b   :  { %v653_v56 = vsel %vm166_vm10, %v649_v55, 0.0 }
 0xa8c   :  { %654 = vadd.xlane.f32.xlu1 %v653_v56 }
 0xb11   :  { %v652_v58 = vpop.xlane.xlu0 %651 }
 0xb12   :  { %v656_v59 = vmul.f32 0.03125, %v652_v58 }
 0xb14   :  { %v658_v60 = vadd.f32 1e-05, %v656_v59 }
 0xb15   :  { %v655_v61 = vpop.xlane.xlu1 %654 }
 0xb16   :  { %1967 = vrsqrt.f32 %v658_v60  ;;  %v657_v62 = vmul.f32 0.03125, %v655_v61 }
 0xb18   :  { %v659_v63 = vadd.f32 1e-05, %v657_v62 }
 0xb1a   :  { %1969 = vrsqrt.f32 %v659_v63 }
 0xb23   :  { %v1968_v0 = vpop.eup %1967 }
 0xb24   :  { %v662_v1 = vmul.f32 %v1968_v0, %v646_v50 }
 0xb26   :  { %v668_v7 = vmul.f32 %v1634_v2, %v662_v1  ;;  %v1937_v1 = vld [vmem:[#allocation2 + $0x58] sm:$0xff]  }
 0xb27   :  { %v1970_v5 = vpop.eup %1969 }
 0xb28   :  { %v663_v6 = vmul.f32 %v1970_v5, %v647_v54  ;;  %v674_v11 = vadd.f32 %v1635_v9, %v668_v7 }
 0xb2a   :  { %v669_v10 = vmul.f32 %v1634_v2, %v663_v6  ;;  %v1938_v2 = vld [vmem:[#allocation2 + $0x50] sm:$0xff]  }
 0xb2c   :  { %v675_v12 = vadd.f32 %v1635_v9, %v669_v10 }
 0xb2e   :  { %v676_v13 = vpack.c.bf16 %v675_v12, %v674_v11 }
 0xb30   :  { %1814 = vmatmul.mubr.msk.bf16.vlgmr.msra.gmra.mxu1 %vm166_vm10, %v676_v13 }
 0xb31   :  { %1833 = vmatprep.mubr.msk.bf16.mxu1 %vm2081_vm11, %v2080_v8  ;;  %1830 = vmatpush3.bf16.msra.mxu1 %v1937_v1 }
 0xb32   :  { %1831 = vmatprep.subr.bf16.mxu1 %v2080_v8 }
 0xb35   :  { %1832 = vmatpush3.bf16.msra.mxu1 %v1938_v2 }
 0xb36   :  { %1837 = vmatprep.subr.bf16.mxu1 %v2080_v8 }
 0xbf0   :  { %v730_v23 = vpop.f32.mrf.mxu1 }
 0xbf1   :  { %v731_v24 = vadd.f32 %v1636_v22, %v730_v23 }
 0xbf2   :  { %v1815_v26 = vpop.f32.mrf.mxu1 }
 0xbf3   :  { %v739_v27 = vmul.f32 0.044715, %v731_v24  ;;  %v737_v40 = vmul.f32 0.5, %v731_v24 }
 0xbf4   :  { %v733_v14 = vpop.f32.mrf.mxu1 }
 0xbf5   :  { %v741_v28 = vmul.f32 %v739_v27, %v731_v24  ;;  %v734_v29 = vadd.f32 %v1636_v22, %v733_v14  ;;  %v1647_v22 = vld [vmem:[#allocation5 + $0xf] ss:$0 sm:$0xff] }
 0xbf6   :  { %v1816_v30 = vpop.f32.mrf.mxu1 }
 0xbf7   :  { %v743_v20 = vmul.f32 %v741_v28, %v731_v24  ;;  %v740_v31 = vmul.f32 0.044715, %v734_v29  ;;  %v738_v41 = vmul.f32 0.5, %v734_v29  ;;  %v1648_v28 = vld [vmem:[#allocation5 + $0x10] ss:$0 sm:$0xff] }
 0xbf9   :  { %v745_v32 = vadd.f32 %v743_v20, %v731_v24  ;;  %v742_v21 = vmul.f32 %v740_v31, %v734_v29 }
 0xbfb   :  { %v747_v33 = vmul.f32 0.7978846, %v745_v32  ;;  %v744_v34 = vmul.f32 %v742_v21, %v734_v29 }
 0xbfd   :  { %1971 = vtanh.f32 %v747_v33  ;;  %v746_v35 = vadd.f32 %v744_v34, %v734_v29 }
 0xbff   :  { %v748_v36 = vmul.f32 0.7978846, %v746_v35 }
 0xc01   :  { %1973 = vtanh.f32 %v748_v36 }
 0xc0a   :  { %v1972_v37 = vpop.eup %1971 }
 0xc0b   :  { %v751_v38 = vadd.f32 1.0, %v1972_v37 }
 0xc0d   :  { %v753_v43 = vmul.f32 %v751_v38, %v737_v40 }
 0xc0e   :  { %v1974_v39 = vpop.eup %1973 }
 0xc0f   :  { %v752_v42 = vadd.f32 1.0, %v1974_v39 }
 0xc11   :  { %v754_v44 = vmul.f32 %v752_v42, %v738_v41 }
 0xc13   :  { %v755_v45 = vpack.c.bf16 %v754_v44, %v753_v43 }
 0xc15   :  { %1826 = vmatmul.mubr.msk.bf16.vlgmr.msra.gmra.mxu0 %vm784_vm13, %v755_v45 }
 0xc16   :  { %1845 = vmatprep.mubr.msk.bf16.mxu0 %vm2081_vm11, %v2080_v8 }
 0xcd5   :  { %v822_v47 = vpop.f32.mrf.mxu0 }
 0xcd6   :  { %v823_v48 = vadd.f32 %v1640_v46, %v822_v47 }
 0xcd7   :  { %v1827_v49 = vpop.f32.mrf.mxu0 }
 0xcd8   :  { %v829_v50 = vadd.f32 %v823_v48, %v674_v11 }
 0xcd9   :  { %v825_v51 = vpop.f32.mrf.mxu0 }
 0xcda   :  { %v826_v52 = vadd.f32 %v1640_v46, %v825_v51  ;;  %v831_v53 = vsel %vm166_vm10, %v829_v50, 0.0 }
 0xcdb   :  { %832 = vadd.xlane.f32.xlu0 %v831_v53  ;;  %v1828_v54 = vpop.f32.mrf.mxu0 }
 0xcdc   :  { %v830_v3 = vadd.f32 %v826_v52, %v675_v12 }
 0xcde   :  { %v834_v55 = vsel %vm166_vm10, %v830_v3, 0.0 }
 0xcdf   :  { %835 = vadd.xlane.f32.xlu1 %v834_v55 }
 0xd64   :  { %v833_v56 = vpop.xlane.xlu0 %832 }
 0xd65   :  { %v837_v57 = vmul.f32 0.03125, %v833_v56 }
 0xd67   :  { %v839_v4 = vsub.f32 %v829_v50, %v837_v57 }
 0xd68   :  { %v836_v58 = vpop.xlane.xlu1 %835 }
 0xd69   :  { %v838_v59 = vmul.f32 0.03125, %v836_v58  ;;  %v841_v60 = vmul.f32 %v839_v4, %v839_v4 }
 0xd6b   :  { %v840_v61 = vsub.f32 %v830_v3, %v838_v59  ;;  %v843_v62 = vsel %vm166_vm10, %v841_v60, 0.0 }
 0xd6c   :  { %844 = vadd.xlane.f32.xlu0 %v843_v62 }
 0xd6d   :  { %v842_v63 = vmul.f32 %v840_v61, %v840_v61 }
 0xd6f   :  { %v846_v0 = vsel %vm166_vm10, %v842_v63, 0.0 }
 0xd70   :  { %847 = vadd.xlane.f32.xlu1 %v846_v0 }
 0xdf5   :  { %v845_v5 = vpop.xlane.xlu0 %844 }
 0xdf6   :  { %v849_v6 = vmul.f32 0.03125, %v845_v5 }
 0xdf8   :  { %v851_v7 = vadd.f32 1e-05, %v849_v6 }
 0xdf9   :  { %v848_v9 = vpop.xlane.xlu1 %847 }
 0xdfa   :  { %1975 = vrsqrt.f32 %v851_v7  ;;  %v850_v10 = vmul.f32 0.03125, %v848_v9 }
 0xdfc   :  { %v852_v11 = vadd.f32 1e-05, %v850_v10 }
 0xdfe   :  { %1977 = vrsqrt.f32 %v852_v11 }
 0xe07   :  { %v1976_v12 = vpop.eup %1975 }
 0xe08   :  { %v855_v13 = vmul.f32 %v1976_v12, %v839_v4 }
 0xe0a   :  { %v861_v19 = vmul.f32 %v1646_v15, %v855_v13 }
 0xe0b   :  { %v1978_v16 = vpop.eup %1977 }
 0xe0c   :  { %v856_v17 = vmul.f32 %v1978_v16, %v840_v61  ;;  %v2253_v24 = vadd.f32 %v1647_v22, %v861_v19 }
 0xe0e   :  { %v862_v23 = vmul.f32 %v1646_v15, %v856_v17 }
 0xe10   :  { %v2255_v26 = vadd.f32 %v1647_v22, %v862_v23 }
 0xe12   :  { %v897_v27 = vpack.c.bf16 %v2255_v26, %v2253_v24 }
 0xe14   :  { %1834 = vmatmul.mubr.msk.bf16.vlgmr.msra.gmra.mxu1 %vm166_vm10, %v897_v27 }
 0xe15   :  { %1839 = vmatprep.mubr.msk.bf16.mxu1 %vm2081_vm11, %v2080_v8 }
 0xed4   :  { %v951_v14 = vpop.f32.mrf.mxu1 }
 0xed5   :  { %v952_v20 = vadd.f32 %v1648_v28, %v951_v14 }
 0xed6   :  { %v1835_v29 = vpop.f32.mrf.mxu1 }
 0xed8   :  { %v954_v30 = vpop.f32.mrf.mxu1 }
 0xed9   :  { %v955_v31 = vadd.f32 %v1648_v28, %v954_v30 }
 0xeda   :  { %v1836_v32 = vpop.f32.mrf.mxu1 }
 0xedb   :  { %v2262_v21 = vpack.c.bf16 %v955_v31, %v952_v20 }
 0xedd   :  { %1085 = vrot.lane.b32.xlu1 %v2262_v21, %s2084_s1  ;;  %960 = vrot.lane.b32.xlu0 %v2262_v21, %s2082_s0 }
 0xee1   :  { %1083 = vrot.lane.b32.xlu1 %v2262_v21, %s2085_s7 }
 0xf4f   :  { %v961_v33 = vpop.permute.xlu0 %960  ;;  %v1086_v35 = vpop.permute.xlu1 %1085 }
 0xf50   :  { %v966_v34 = vsel %vm318_vm12, %v961_v33, 0  ;;  %v1091_v36 = vsel %vm318_vm12, %v1086_v35, 0  ;;  %v1939_v33 = vld [vmem:[#allocation2 + $0x68] sm:$0xff]  }
 0xf51   :  { %1838 = vmatpush3.bf16.xpose.msra.mxu1 %v966_v34 }
 0xf52   :  { %1849 = vmatprep.subr.bf16.mxu1 %v2080_v8 }
 0xf53   :  { %v1084_v37 = vpop.permute.xlu1 %1083 }
 0xf58   :  { %1840 = vmatmul.mubr.msk.bf16.vlgmr.msra.gmra.mxu1 %vm318_vm12, %v2262_v21 }
 0xf59   :  { %1850 = vmatpush3.bf16.xpose.msra.mxu1 %v1091_v36  ;;  %1851 = vmatprep.mubr.msk.bf16.mxu1 %vm2081_vm11, %v2080_v8  ;;  %v1940_v36 = vld [vmem:[#allocation2 + $0x60] sm:$0xff]  }
 0xf5a   :  { %1861 = vmatprep.subr.bf16.mxu1 %v2080_v8 }
 0xf60   :  { %1852 = vmatmul.mubr.msk.bf16.vlgmr.msra.gmra.mxu1 %vm318_vm12, %v1084_v37 }
 0xf61   :  { %1865 = vmatprep.mubr.msk.bf16.mxu1 %vm2081_vm11, %v2080_v8  ;;  %1862 = vmatpush3.bf16.msra.mxu1 %v1939_v33 }
 0xf62   :  { %1863 = vmatprep.subr.bf16.mxu1 %v2080_v8 }
 0xf65   :  { %1864 = vmatpush3.bf16.msra.mxu1 %v1940_v36 }
 0xf66   :  { %1877 = vmatprep.subr.bf16.mxu1 %v2080_v8 }
0x1018   :  { %v1002_v38 = vpop.f32.mrf.mxu1 }
0x1019   :  { %v1009_v39 = vmul.f32 0.25, %v1002_v38 }
0x101a   :  { %v1841_v40 = vpop.f32.mrf.mxu1 }
0x101b   :  { %v1011_v41 = vadd.f32 %v1009_v39, %v2179_v18 }
0x101c   :  { %v1005_v42 = vpop.f32.mrf.mxu1 }
0x101d   :  { %v1010_v43 = vmul.f32 0.25, %v1005_v42  ;;  %v1013_v44 = vsel %vm318_vm12, %v1011_v41, -inf }
0x101e   :  { %1014 = vmax.xlane.f32.xlu0 %v1013_v44  ;;  %v1842_v45 = vpop.f32.mrf.mxu1 }
0x101f   :  { %v1012_v46 = vadd.f32 %v1010_v43, %v2184_v25 }
0x1020   :  { %v1127_v47 = vpop.f32.mrf.mxu1 }
0x1021   :  { %v1134_v48 = vmul.f32 0.25, %v1127_v47  ;;  %v1016_v49 = vsel %vm318_vm12, %v1012_v46, -inf }
0x1022   :  { %1017 = vmax.xlane.f32.xlu1 %v1016_v49  ;;  %v1853_v50 = vpop.f32.mrf.mxu1 }
0x1023   :  { %v1136_v51 = vadd.f32 %v1134_v48, %v2179_v18  ;;  %v1656_v50 = vld [vmem:[#allocation5 + $0x11] ss:$0 sm:$0xff] }
0x1024   :  { %v1130_v52 = vpop.f32.mrf.mxu1 }
0x1025   :  { %v1135_v53 = vmul.f32 0.25, %v1130_v52  ;;  %v1138_v54 = vsel %vm318_vm12, %v1136_v51, -inf }
0x1026   :  { %1139 = vmax.xlane.f32.xlu0 %v1138_v54  ;;  %v1854_v3 = vpop.f32.mrf.mxu1 }
0x1027   :  { %v1137_v55 = vadd.f32 %v1135_v53, %v2184_v25 }
0x1029   :  { %v1141_v56 = vsel %vm318_vm12, %v1137_v55, -inf }
0x102a   :  { %1142 = vmax.xlane.f32.xlu0 %v1141_v56 }
0x10a7   :  { %v1015_v57 = vpop.xlane.xlu0 %1014 }
0x10a8   :  { %v1019_v4 = vsub.f32 %v1011_v41, %v1015_v57 }
0x10aa   :  { %v1021_v58 = vmul.f32 1.442695, %v1019_v4 }
0x10ab   :  { %v1018_v59 = vpop.xlane.xlu1 %1017 }
0x10ac   :  { %1979 = vpow2.f32 %v1021_v58  ;;  %v1020_v60 = vsub.f32 %v1012_v46, %v1018_v59 }
0x10ae   :  { %v1023_v61 = vmul.f32 1.442695, %v1020_v60 }
0x10af   :  { %v1140_v62 = vpop.xlane.xlu0 %1139 }
0x10b0   :  { %1981 = vpow2.f32 %v1023_v61  ;;  %v1144_v18 = vsub.f32 %v1136_v51, %v1140_v62 }
0x10b2   :  { %v1146_v63 = vmul.f32 1.442695, %v1144_v18 }
0x10b3   :  { %v1143_v0 = vpop.xlane.xlu0 %1142 }
0x10b4   :  { %1983 = vpow2.f32 %v1146_v63  ;;  %v1145_v1 = vsub.f32 %v1137_v55, %v1143_v0 }
0x10b6   :  { %v1148_v2 = vmul.f32 1.442695, %v1145_v1 }
0x10b8   :  { %1985 = vpow2.f32 %v1148_v2 }
0x10b9   :  { %v1980_v25 = vpop.eup %1979 }
0x10ba   :  { %v1025_v5 = vsel %vm318_vm12, %v1980_v25, 0.0 }
0x10bb   :  { %1026 = vadd.xlane.f32.xlu1 %v1025_v5 }
0x10bd   :  { %v1982_v6 = vpop.eup %1981 }
0x10be   :  { %v1028_v7 = vsel %vm318_vm12, %v1982_v6, 0.0 }
0x10bf   :  { %1029 = vadd.xlane.f32.xlu0 %v1028_v7 }
0x10c1   :  { %v1984_v9 = vpop.eup %1983 }
0x10c2   :  { %v1150_v10 = vsel %vm318_vm12, %v1984_v9, 0.0 }
0x10c3   :  { %1151 = vadd.xlane.f32.xlu1 %v1150_v10 }
0x10c5   :  { %v1986_v11 = vpop.eup %1985 }
0x10c6   :  { %v1153_v12 = vsel %vm318_vm12, %v1986_v11, 0.0 }
0x10c7   :  { %1154 = vadd.xlane.f32.xlu0 %v1153_v12 }
0x10d4   :  { %1036 = vrot.lane.b32.xlu1 %v2262_v21, %s2074_s18 }
0x10dd   :  { %1161 = vrot.lane.b32.xlu0 %v2262_v21, %s2086_s8 }
0x1144   :  { %v1027_v13 = vpop.xlane.xlu1 %1026 }
0x1145   :  { %1987 = vrcp.f32 %v1027_v13 }
0x1148   :  { %v1030_v15 = vpop.xlane.xlu0 %1029 }
0x1149   :  { %1989 = vrcp.f32 %v1030_v15  ;;  %v1660_v15 = vld [vmem:[#allocation5 + $0x12] ss:$0 sm:$0xff] }
0x114c   :  { %v1152_v16 = vpop.xlane.xlu1 %1151 }
0x114d   :  { %1991 = vrcp.f32 %v1152_v16 }
0x1150   :  { %v1037_v17 = vpop.permute.xlu1 %1036  ;;  %v1155_v19 = vpop.xlane.xlu0 %1154 }
0x1151   :  { %1993 = vrcp.f32 %v1155_v19  ;;  %1844 = vmatpush3.bf16.msra.mxu0 %v1037_v17 }
0x1152   :  { %1855 = vmatprep.subr.bf16.mxu0 %v2080_v8  ;;  %v1988_v22 = vpop.eup %1987 }
0x1153   :  { %v1033_v27 = vmul.f32 %v1988_v22, %v1980_v25  ;;  %v1941_v25 = vld [vmem:[#allocation2 + $0x78] sm:$0xff]   ;;  %v1661_v22 = vld [vmem:[#allocation5 + $0x13] ss:$0 sm:$0xff] }
0x1154   :  { %v1162_v29 = vpop.permute.xlu0 %1161 }
0x1156   :  { %v1990_v23 = vpop.eup %1989 }
0x1157   :  { %v1034_v14 = vmul.f32 %v1990_v23, %v1982_v6 }
0x1159   :  { %v1035_v28 = vpack.c.bf16 %v1034_v14, %v1033_v27 }
0x115a   :  { %v1992_v30 = vpop.eup %1991 }
0x115b   :  { %1846 = vmatmul.mubr.msk.bf16.vlgmr.msra.gmra.mxu0 %vm318_vm12, %v1035_v28  ;;  %v1158_v31 = vmul.f32 %v1992_v30, %v1984_v9  ;;  %v1944_v30 = vld [vmem:[#allocation2 + $0x90] sm:$0xff]  }
0x115c   :  { %1856 = vmatpush3.bf16.msra.mxu0 %v1162_v29  ;;  %1857 = vmatprep.mubr.msk.bf16.mxu0 %vm2081_vm11, %v2080_v8  ;;  %v1943_v29 = vld [vmem:[#allocation2 + $0x98] sm:$0xff]  }
0x115d   :  { %1869 = vmatprep.subr.bf16.mxu0 %v2080_v8 }
0x115e   :  { %v1994_v20 = vpop.eup %1993 }
0x115f   :  { %v1159_v32 = vmul.f32 %v1994_v20, %v1986_v11  ;;  %v1945_v20 = vld [vmem:[#allocation2 + $0x88] sm:$0xff]  }
0x1161   :  { %v1160_v21 = vpack.c.bf16 %v1159_v32, %v1158_v31  ;;  %v1946_v31 = vld [vmem:[#allocation2 + $0x80] sm:$0xff]   ;;  %v1662_v32 = vld [vmem:[#allocation5 + $0x14] ss:$0 sm:$0xff] }
0x1163   :  { %1858 = vmatmul.mubr.msk.bf16.vlgmr.msra.gmra.mxu0 %vm318_vm12, %v1160_v21 }
0x1164   :  { %1873 = vmatprep.mubr.msk.bf16.mxu0 %vm2081_vm11, %v2080_v8  ;;  %1870 = vmatpush3.bf16.msra.mxu0 %v1941_v25 }
0x1165   :  { %1871 = vmatprep.subr.bf16.mxu0 %v2080_v8 }
0x121b   :  { %v1076_v34 = vpop.f32.mrf.mxu0 }
0x121d   :  { %v1847_v35 = vpop.f32.mrf.mxu0 }
0x121f   :  { %v1079_v37 = vpop.f32.mrf.mxu0 }
0x1221   :  { %v1848_v38 = vpop.f32.mrf.mxu0 }
0x1223   :  { %v1201_v39 = vpop.f32.mrf.mxu0 }
0x1225   :  { %v1859_v40 = vpop.f32.mrf.mxu0 }
0x1227   :  { %v1204_v41 = vpop.f32.mrf.mxu0 }
0x1228   :  { %v1922_v42 = vpack.i.bf16 %v1204_v41, %v1201_v39 }
0x1229   :  { %v1860_v43 = vpop.f32.mrf.mxu0 }
0x122a   :  { %1923 = vrot.lane.b32.xlu1 %v1922_v42, %s2087_s9 }
0x129c   :  { %v1924_v44 = vpop.permute.xlu1 %1923 }
0x129d   :  { %v1926_v45 = vunpack.i.h.bf16 %v1924_v44  ;;  %v1925_v46 = vunpack.i.l.bf16 %v1924_v44 }
0x129f   :  { %v1217_v47 = vsel %vm318_vm12, %v1079_v37, %v1926_v45  ;;  %v1216_v48 = vsel %vm318_vm12, %v1076_v34, %v1925_v46 }
0x12a0   :  { %v1218_v49 = vpack.c.bf16 %v1217_v47, %v1216_v48 }
0x12a2   :  { %1866 = vmatmul.mubr.msk.bf16.vlgmr.msra.gmra.mxu1 %vm166_vm10, %v1218_v49 }
0x12a3   :  { %1885 = vmatprep.mubr.msk.bf16.mxu1 %vm2081_vm11, %v2080_v8  ;;  %1878 = vmatpush3.bf16.msra.mxu1 %v1943_v29 }
0x12a4   :  { %1879 = vmatprep.subr.bf16.mxu1 %v2080_v8 }
0x12a7   :  { %1880 = vmatpush3.bf16.msra.mxu1 %v1944_v30  ;;  %v1672_v30 = vld [vmem:[#allocation5 + $0x16] ss:$0 sm:$0xff] }
0x12a8   :  { %1881 = vmatprep.subr.bf16.mxu1 %v2080_v8 }
0x12ab   :  { %1882 = vmatpush3.bf16.msra.mxu1 %v1945_v20 }
0x12ac   :  { %1883 = vmatprep.subr.bf16.mxu1 %v2080_v8 }
0x12af   :  { %1884 = vmatpush3.bf16.msra.mxu1 %v1946_v31 }
0x1362   :  { %v1272_v51 = vpop.f32.mrf.mxu1 }
0x1363   :  { %v1273_v52 = vadd.f32 %v1656_v50, %v1272_v51 }
0x1364   :  { %v1867_v53 = vpop.f32.mrf.mxu1 }
0x1365   :  { %v1279_v54 = vadd.f32 %v1273_v52, %v2253_v24 }
0x1366   :  { %v1275_v3 = vpop.f32.mrf.mxu1 }
0x1367   :  { %v1276_v55 = vadd.f32 %v1656_v50, %v1275_v3  ;;  %v1281_v56 = vsel %vm166_vm10, %v1279_v54, 0.0 }
0x1368   :  { %1282 = vadd.xlane.f32.xlu1 %v1281_v56  ;;  %v1868_v57 = vpop.f32.mrf.mxu1  ;;  %v1666_v56 = vld [vmem:[#allocation5 + $0x15] ss:$0 sm:$0xff] }
0x1369   :  { %v1280_v4 = vadd.f32 %v1276_v55, %v2255_v26  ;;  %v1942_v26 = vld [vmem:[#allocation2 + $0x70] sm:$0xff]  }
0x136a   :  { %1872 = vmatpush3.bf16.msra.mxu0 %v1942_v26 }
0x136b   :  { %v1284_v58 = vsel %vm166_vm10, %v1280_v4, 0.0  ;;  %1889 = vmatprep.subr.mxu0 %v2080_v8 }
0x136c   :  { %1285 = vadd.xlane.f32.xlu0 %v1284_v58 }
0x13f1   :  { %v1283_v59 = vpop.xlane.xlu1 %1282 }
0x13f2   :  { %v1287_v60 = vmul.f32 0.03125, %v1283_v59 }
0x13f4   :  { %v1289_v61 = vsub.f32 %v1279_v54, %v1287_v60 }
0x13f5   :  { %v1286_v62 = vpop.xlane.xlu0 %1285 }
0x13f6   :  { %v1288_v18 = vmul.f32 0.03125, %v1286_v62  ;;  %v1291_v63 = vmul.f32 %v1289_v61, %v1289_v61 }
0x13f8   :  { %v1290_v0 = vsub.f32 %v1280_v4, %v1288_v18  ;;  %v1293_v24 = vsel %vm166_vm10, %v1291_v63, 0.0 }
0x13f9   :  { %1294 = vadd.xlane.f32.xlu0 %v1293_v24 }
0x13fa   :  { %v1292_v1 = vmul.f32 %v1290_v0, %v1290_v0 }
0x13fc   :  { %v1296_v2 = vsel %vm166_vm10, %v1292_v1, 0.0 }
0x13fd   :  { %1297 = vadd.xlane.f32.xlu1 %v1296_v2 }
0x1482   :  { %v1295_v5 = vpop.xlane.xlu0 %1294 }
0x1483   :  { %v1299_v6 = vmul.f32 0.03125, %v1295_v5 }
0x1485   :  { %v1301_v7 = vadd.f32 1e-05, %v1299_v6 }
0x1486   :  { %v1298_v9 = vpop.xlane.xlu1 %1297 }
0x1487   :  { %1995 = vrsqrt.f32 %v1301_v7  ;;  %v1300_v10 = vmul.f32 0.03125, %v1298_v9 }
0x1489   :  { %v1302_v11 = vadd.f32 1e-05, %v1300_v10 }
0x148b   :  { %1997 = vrsqrt.f32 %v1302_v11  ;;  %v1519_v11 = vld [vmem:[#allocation5 + $0x38] sm:$0xff] }
0x1494   :  { %v1996_v12 = vpop.eup %1995 }
0x1495   :  { %v1305_v13 = vmul.f32 %v1996_v12, %v1289_v61  ;;  %v1518_v12 = vld [vmem:[#allocation5 + $0x30] sm:$0xff] }
0x1497   :  { %v1311_v19 = vmul.f32 %v1660_v15, %v1305_v13  ;;  %v1517_v13 = vld [vmem:[#allocation5 + $0x28] sm:$0xff] }
0x1498   :  { %v1998_v16 = vpop.eup %1997 }
0x1499   :  { %v1306_v17 = vmul.f32 %v1998_v16, %v1290_v0  ;;  %v1317_v27 = vadd.f32 %v1661_v22, %v1311_v19 }
0x149b   :  { %v1312_v23 = vmul.f32 %v1660_v15, %v1306_v17  ;;  %v1516_v15 = vld [vmem:[#allocation5 + $0x20] sm:$0xff] }
0x149d   :  { %v1318_v14 = vadd.f32 %v1661_v22, %v1312_v23 }
0x149f   :  { %v1319_v28 = vpack.c.bf16 %v1318_v14, %v1317_v27 }
0x14a1   :  { %1874 = vmatmul.mubr.msk.bf16.vlgmr.msra.gmra.mxu0 %vm166_vm10, %v1319_v28 }
0x14a2   :  { %1897 = vmatprep.mubr.msk.f32.mxu0 %vm2081_vm11, %v2080_v8  ;;  %1890 = vmatpush3.msra.mxu0 %v1519_v11 }
0x14a3   :  { %1891 = vmatprep.subr.mxu0 %v2080_v8 }
0x14a4   :  { %1892 = vmatpush3.msra.mxu0 %v1518_v12 }
0x14a5   :  { %1893 = vmatprep.subr.mxu0 %v2080_v8 }
0x14a6   :  { %1894 = vmatpush3.msra.mxu0 %v1517_v13 }
0x14a7   :  { %1895 = vmatprep.subr.mxu0 %v2080_v8 }
0x14a8   :  { %1896 = vmatpush3.msra.mxu0 %v1516_v15 }
0x1561   :  { %v1373_v21 = vpop.f32.mrf.mxu0 }
0x1562   :  { %v1374_v33 = vadd.f32 %v1662_v32, %v1373_v21  ;;  %v1673_v21 = vld [vmem:[#allocation5 + $0x17] ss:$0 sm:$0xff] }
0x1563   :  { %v1875_v34 = vpop.f32.mrf.mxu0 }
0x1564   :  { %v1382_v35 = vmul.f32 0.044715, %v1374_v33  ;;  %v1380_v51 = vmul.f32 0.5, %v1374_v33 }
0x1565   :  { %v1376_v36 = vpop.f32.mrf.mxu0 }
0x1566   :  { %v1384_v37 = vmul.f32 %v1382_v35, %v1374_v33  ;;  %v1377_v38 = vadd.f32 %v1662_v32, %v1376_v36  ;;  %v1674_v36 = vld [vmem:[#allocation5 + $0x18] ss:$0 sm:$0xff] }
0x1567   :  { %v1876_v39 = vpop.f32.mrf.mxu0 }
0x1568   :  { %v1386_v40 = vmul.f32 %v1384_v37, %v1374_v33  ;;  %v1383_v41 = vmul.f32 0.044715, %v1377_v38  ;;  %v1381_v52 = vmul.f32 0.5, %v1377_v38 }
0x156a   :  { %v1388_v42 = vadd.f32 %v1386_v40, %v1374_v33  ;;  %v1385_v43 = vmul.f32 %v1383_v41, %v1377_v38 }
0x156c   :  { %v1390_v44 = vmul.f32 0.7978846, %v1388_v42  ;;  %v1387_v45 = vmul.f32 %v1385_v43, %v1377_v38 }
0x156e   :  { %1999 = vtanh.f32 %v1390_v44  ;;  %v1389_v46 = vadd.f32 %v1387_v45, %v1377_v38 }
0x1570   :  { %v1391_v47 = vmul.f32 0.7978846, %v1389_v46 }
0x1572   :  { %2001 = vtanh.f32 %v1391_v47 }
0x157b   :  { %v2000_v48 = vpop.eup %1999 }
0x157c   :  { %v1394_v49 = vadd.f32 1.0, %v2000_v48 }
0x157e   :  { %v1396_v54 = vmul.f32 %v1394_v49, %v1380_v51 }
0x157f   :  { %v2002_v50 = vpop.eup %2001 }
0x1580   :  { %v1395_v53 = vadd.f32 1.0, %v2002_v50 }
0x1582   :  { %v1397_v3 = vmul.f32 %v1395_v53, %v1381_v52 }
0x1584   :  { %v1398_v55 = vpack.c.bf16 %v1397_v3, %v1396_v54 }
0x1586   :  { %1886 = vmatmul.mubr.msk.bf16.vlgmr.msra.gmra.mxu1 %vm784_vm13, %v1398_v55 }
0x1646   :  { %v1464_v57 = vpop.f32.mrf.mxu1 }
0x1647   :  { %v1465_v4 = vadd.f32 %v1666_v56, %v1464_v57 }
0x1648   :  { %v1887_v58 = vpop.f32.mrf.mxu1 }
0x1649   :  { %v1471_v59 = vadd.f32 %v1465_v4, %v1317_v27 }
0x164a   :  { %v1467_v60 = vpop.f32.mrf.mxu1 }
0x164b   :  { %v1468_v61 = vadd.f32 %v1666_v56, %v1467_v60  ;;  %v1473_v62 = vsel %vm166_vm10, %v1471_v59, 0.0 }
0x164c   :  { %1474 = vadd.xlane.f32.xlu1 %v1473_v62  ;;  %v1888_v18 = vpop.f32.mrf.mxu1 }
0x164d   :  { %v1472_v63 = vadd.f32 %v1468_v61, %v1318_v14 }
0x164f   :  { %v1476_v0 = vsel %vm166_vm10, %v1472_v63, 0.0 }
0x1650   :  { %1477 = vadd.xlane.f32.xlu0 %v1476_v0 }
0x16d5   :  { %v1475_v24 = vpop.xlane.xlu1 %1474 }
0x16d6   :  { %v1479_v1 = vmul.f32 0.03125, %v1475_v24 }
0x16d8   :  { %v1481_v2 = vsub.f32 %v1471_v59, %v1479_v1 }
0x16d9   :  { %v1478_v25 = vpop.xlane.xlu0 %1477 }
0x16da   :  { %v1480_v26 = vmul.f32 0.03125, %v1478_v25  ;;  %v1483_v5 = vmul.f32 %v1481_v2, %v1481_v2 }
0x16dc   :  { %v1482_v6 = vsub.f32 %v1472_v63, %v1480_v26  ;;  %v1485_v7 = vsel %vm166_vm10, %v1483_v5, 0.0 }
0x16dd   :  { %1486 = vadd.xlane.f32.xlu1 %v1485_v7 }
0x16de   :  { %v1484_v9 = vmul.f32 %v1482_v6, %v1482_v6 }
0x16e0   :  { %v1488_v10 = vsel %vm166_vm10, %v1484_v9, 0.0 }
0x16e1   :  { %1489 = vadd.xlane.f32.xlu0 %v1488_v10 }
0x1766   :  { %v1487_v16 = vpop.xlane.xlu1 %1486 }
0x1767   :  { %v1491_v17 = vmul.f32 0.03125, %v1487_v16 }
0x1769   :  { %v1493_v19 = vadd.f32 1e-05, %v1491_v17 }
0x176a   :  { %v1490_v22 = vpop.xlane.xlu0 %1489 }
0x176b   :  { %2003 = vrsqrt.f32 %v1493_v19  ;;  %v1492_v23 = vmul.f32 0.03125, %v1490_v22 }
0x176d   :  { %v1494_v27 = vadd.f32 1e-05, %v1492_v23 }
0x176f   :  { %2005 = vrsqrt.f32 %v1494_v27 }
0x1778   :  { %v2004_v14 = vpop.eup %2003 }
0x1779   :  { %v1497_v28 = vmul.f32 %v2004_v14, %v1481_v2 }
0x177b   :  { %v1503_v31 = vmul.f32 %v1672_v30, %v1497_v28 }
0x177c   :  { %v2006_v29 = vpop.eup %2005 }
0x177d   :  { %v1498_v20 = vmul.f32 %v2006_v29, %v1482_v6  ;;  %v1509_v8 = vadd.f32 %v1673_v21, %v1503_v31 }
0x177f   :  { %v1504_v32 = vmul.f32 %v1672_v30, %v1498_v20 }
0x1781   :  { %v1510_v33 = vadd.f32 %v1673_v21, %v1504_v32 }
0x1783   :  { %v1512_v34 = vrot.slane %v1510_v33, 7 }
0x1785   :  { %v1515_v35 = vsel %vm1514_vm14, %v1509_v8, %v1512_v34 }
0x1786   :  { %1898 = vmatmul.mubr.msk.f32.vlgmr.msra.gmra.mxu0 %vm166_vm10, %v1515_v35 }
0x1846   :  { %v1594_v37 = vpop.f32.mrf.mxu0 }
0x1847   :  { %v1595_v38 = vadd.f32 %v1674_v36, %v1594_v37 }
0x1848   :  { %v1899_v39 = vpop.f32.mrf.mxu0 }
0x1849   :  { %1598 = vst [vmem:[#allocation7] sm:$0x3] %v1595_v38 }
0x184a   :  { %2058 = shalt.err (!%p2055_p0)
}
0x184b   :  { %1608 = dma.vmem_to_hbm [thread:$0]  %s1606_s11, 32, %s2343_s4, [#allocation4]  }
0x184c   :  { %2071 = dma.done.wait [#allocation4], 32  }
0x184d   :  { %2072 = vsyncadd [#allocation4], 4294967264 }
0x184e   :  { %1612 = vsyncpa [#allocation3], 1 }
0x184f   :  { %1613 = vsyncpa [#allocation6], 1 }
0x1850   :  { %1614 = vsyncpa [#allocation4], 1 }

</bundles_post_ra>
